<compile_context>
chip_gen: v5e
topology: v5e:2x2
jax: 0.10.0
libtpu: 0.0.40
codegen_flags: <defaults>
</compile_context>

<pallas_src>
import functools

import jax
import jax.numpy as jnp
from jax.experimental import pallas as pl
from jax.experimental.pallas import tpu as pltpu


def _round_up(x, m):
    return (x + m - 1) // m * m


def _device_kind():
    try:
        return jax.devices()[0].device_kind.lower()
    except Exception:
        return ""


def _is_v5e(kind):
    return ("v5 lite" in kind) or ("v5e" in kind) or ("v5lite" in kind)


def _is_v7(kind):
    return ("v7" in kind) or ("tpu7" in kind)


def _vmem_policy(kind):
    """(tile budget bytes, vmem_limit_bytes) per TPU generation."""
    if _is_v7(kind):
        # v7x: 64 MiB physical VMEM per TensorCore -> stay well under it.
        return 24 * 2**20, 48 * 2**20
    # v5e / v6e (128 MiB physical): raise the 32 MiB scoped default.
    return 48 * 2**20, 100 * 2**20


def _attn_kernel(h_ref, enc_ref, wh_ref, ws_ref, b_ref, v_ref, out_ref, *scratch,
                 seq_len, n_seq, compute_dtype):
    """One (batch-tile, seq-tile) grid step of pointer-network additive attention.

    h_ref:   (TB, H)      decoder hidden, batch tile            [mxu dtype]
    enc_ref: (TB, TL, H)  encoder outputs, seq tile             [mxu dtype]
    wh_ref:  (H, H)       Wh weight, (in, out) layout           [grid-resident]
    ws_ref:  (H, H)       Ws weight, (in, out) layout           [grid-resident]
    b_ref:   (1, H)       folded bias Wh_b + Ws_b, f32          [grid-resident]
    v_ref:   (1, H)       v weight as a row vector, f32         [grid-resident]
    out_ref: (TB, Lo)     softmax weights, Lo = round_up(L_pad, 128), resident
                          across the seq grid axis, written at the last seq step
    scratch: optional (TB, Lo) f32 score buffer (carried across seq tiles, and
             used to widen scores to the lane-dense output width)
    """
    k = pl.program_id(1)
    tb, tl, h_dim = enc_ref.shape
    l_out = out_ref.shape[-1]
    score_ref = scratch[0] if scratch else None
    neg = jnp.float32(-1e30)

    # ---- MXU (bf16 operands when mxu dtype is bf16; always f32 accumulation) --
    # Wh(hidden) + (Wh_b + Ws_b): tiny vs the Ws matmul, recomputed per seq step.
    wh = jnp.dot(h_ref[...], wh_ref[...],
                 preferred_element_type=jnp.float32) + b_ref[...]        # (TB, H) f32

    # Ws(enc): flatten (TB, TL, H) -> (TB*TL, H) for one large MXU matmul.
    # TL % 16 == 0 keeps the flatten layout-free for both f32 and bf16.
    enc2d = enc_ref[...].reshape(tb * tl, h_dim)
    ws = jnp.dot(enc2d, ws_ref[...],
                 preferred_element_type=jnp.float32).reshape(tb, tl, h_dim)

    # ---- VPU/EUP: tanh chain in compute_dtype (bf16 on v6e/v7x, f32 on v5e) ---
    energy = jnp.tanh((ws + wh[:, None, :]).astype(compute_dtype))        # (TB, TL, H)
    # v-projection as multiply + lane reduce (no N=1 MXU matmul); v_b is dropped
    # (softmax is shift-invariant).  Reduction accumulates in f32.
    prod = energy * v_ref[...].astype(compute_dtype)
    score = jnp.sum(prod.astype(jnp.float32), axis=-1)                    # (TB, TL) f32

    if seq_len < n_seq * tl:          # static check: mask zero-padded positions
        pos = k * tl + jax.lax.broadcasted_iota(jnp.int32, (tb, tl), 1)
        score = jnp.where(pos < seq_len, score, neg)

    def _softmax_store(s):
        m = jnp.max(s, axis=-1, keepdims=True)
        e = jnp.exp(s - m)
        denom = jnp.sum(e, axis=-1, keepdims=True)
        out_ref[...] = e / denom      # exact normalization: rows sum to 1

    if n_seq == 1:
        if l_out > tl:
            # Widen to the lane-dense output width: fill only the tail columns.
            score_ref[:, tl:] = jnp.full((tb, l_out - tl), neg, jnp.float32)
            score_ref[:, :tl] = score
            _softmax_store(score_ref[...])
        else:
            _softmax_store(score)
    else:
        # Multi seq-tile: stash this tile's scores in the carried scratch.  One
        # pl.when branch per (static) tile index -> only static, 128-aligned
        # lane-offset stores; no dynamic lane indexing.
        if l_out > n_seq * tl:
            @pl.when(k == 0)
            def _():
                score_ref[:, n_seq * tl:] = jnp.full(
                    (tb, l_out - n_seq * tl), neg, jnp.float32)

        for kk in range(n_seq):
            @pl.when(k == kk)
            def _(kk=kk):
                score_ref[:, kk * tl:(kk + 1) * tl] = score

        @pl.when(k == n_seq - 1)
        def _():
            _softmax_store(score_ref[...])


def _choose_tiles(batch, seq_len, h_dim, mxu_bytes, comp_bytes,
                  vmem_budget, vmem_limit, block_b=None, block_l=None):
    """Pick (tb, b_pad, tl, l_pad, n_seq, l_out) from a VMEM budget."""
    l16 = _round_up(seq_len, 16)
    # Dominant per-(batch row, seq position) VMEM bytes: double-buffered encoder
    # tile + ws/pre f32 temporaries + energy/prod compute-dtype temporaries.
    per_pos = h_dim * (2 * mxu_bytes + 8 + 2 * comp_bytes) + 16
    # Grid-resident weights (worst case: double buffered) + bias/v rows.
    fixed = 2 * h_dim * h_dim * mxu_bytes * 2 + 4 * h_dim * 4
    avail = max(vmem_budget - fixed, 1 << 20)

    # ---- sequence tile ----
    if block_l is not None:
        bl = _round_up(max(int(block_l), 16), 16)
        tl = l16 if bl >= l16 else max(128, (bl // 128) * 128)
    elif l16 <= 128 or (l16 <= 512 and per_pos * l16 * 16 <= avail):
        tl = l16                                     # single seq tile
    else:
        tl = 128                                     # seq-tiled, 128-aligned
        for cand in (512, 256):
            if cand < l16 and per_pos * cand * 64 <= avail:
                tl = cand
                break
    l_pad = _round_up(seq_len, tl)
    n_seq = l_pad // tl
    l_out = _round_up(l_pad, 128)

    # ---- batch tile ----
    b16 = _round_up(batch, 16)
    per_row = per_pos * tl + 12 * l_out + (2 * mxu_bytes + 4) * h_dim
    if block_b is not None:
        tb = _round_up(max(int(block_b), 16), 16)
    else:
        tb = max(16, (int(avail // per_row) // 16) * 16)
        floor_tb = min(128, b16)
        if tb < floor_tb and fixed + per_row * floor_tb <= vmem_limit:
            tb = floor_tb          # MXU-friendly M dim, fewer/longer grid steps
    tb = max(16, min(tb, 1024, b16))
    b_pad = _round_up(batch, tb)
    return tb, b_pad, tl, l_pad, n_seq, l_out


def attn_forward(hidden, encoder_outputs, params, *, block_b=None, block_l=None,
                 mxu_dtype=jnp.float32, compute_dtype=None, vmem_budget_bytes=None):
    """hidden: (1, B, H), encoder_outputs: (L, B, H) -> (B, L) attention weights.

    mxu_dtype=bf16 stores hidden/encoder/Wh/Ws in HBM as bf16 (halves encoder DMA
    and VMEM) and feeds the MXU bf16 with f32 accumulation.  compute_dtype
    controls the tanh/elementwise chain; default is bf16 on v6e/v7x (bf16 EUP)
    and f32 on v5e / unknown devices.  Accuracy with bf16 is ~1e-2 on the
    attention weights; softmax itself is always computed in f32.
    """
    L, B, H = encoder_outputs.shape
    mxu_dtype = jnp.dtype(mxu_dtype)

    kind = _device_kind()
    if compute_dtype is None:
        compute_dtype = (jnp.bfloat16
                         if (mxu_dtype == jnp.dtype(jnp.bfloat16) and not _is_v5e(kind))
                         else jnp.float32)
    compute_dtype = jnp.dtype(compute_dtype)

    budget, vmem_limit = _vmem_policy(kind)
    if vmem_budget_bytes is not None:
        budget = int(vmem_budget_bytes)
        vmem_limit = max(vmem_limit, min(2 * budget, 120 * 2**20))

    tb, b_pad, tl, l_pad, n_seq, l_out = _choose_tiles(
        B, L, H, mxu_dtype.itemsize, compute_dtype.itemsize,
        budget, vmem_limit, block_b=block_b, block_l=block_l)

    # Batch-first operands, stored in HBM at the MXU dtype.
    h_p = hidden[0].astype(mxu_dtype)                                      # (B, H)
    enc_p = jnp.transpose(encoder_outputs, (1, 0, 2)).astype(mxu_dtype)    # (B, L, H)
    if l_pad != L:
        enc_p = jnp.pad(enc_p, ((0, 0), (0, l_pad - L), (0, 0)))
    if b_pad != B:
        h_p = jnp.pad(h_p, ((0, b_pad - B), (0, 0)))
        enc_p = jnp.pad(enc_p, ((0, b_pad - B), (0, 0), (0, 0)))

    # Weights in (in, out) layout at the MXU dtype; biases folded (f32); v as an
    # f32 row vector; v_b dropped (softmax shift invariance).
    wh_t = params['Wh_w'].T.astype(mxu_dtype)
    ws_t = params['Ws_w'].T.astype(mxu_dtype)
    bias = (params['Wh_b'] + params['Ws_b']).reshape(1, H).astype(jnp.float32)
    v_row = params['v_w'].reshape(1, H).astype(jnp.float32)

    kernel = functools.partial(_attn_kernel, seq_len=L, n_seq=n_seq,
                               compute_dtype=compute_dtype)
    need_scratch = (n_seq > 1) or (l_out > tl)
    scratch_shapes = ([pltpu.VMEM((tb, l_out), jnp.float32)]
                      if need_scratch else [])

    def build(single_buffer_resident):
        def resident(shape):
            kwargs = {}
            if single_buffer_resident:
                # Constant index map -> one buffer is enough; reclaims VMEM.
                kwargs['pipeline_mode'] = pl.Buffered(1)
            return pl.BlockSpec(shape, lambda i, k: (0,) * len(shape), **kwargs)

        return pl.pallas_call(
            kernel,
            out_shape=jax.ShapeDtypeStruct((b_pad, l_out), jnp.float32),
            grid=(b_pad // tb, n_seq),
            in_specs=[
                pl.BlockSpec((tb, H), lambda i, k: (i, 0)),          # hidden tile
                pl.BlockSpec((tb, tl, H), lambda i, k: (i, k, 0)),   # encoder tile
                resident((H, H)),                                    # Wh
                resident((H, H)),                                    # Ws
                resident((1, H)),                                    # bias
                resident((1, H)),                                    # v
            ],
            out_specs=pl.BlockSpec((tb, l_out), lambda i, k: (i, 0)),
            scratch_shapes=scratch_shapes,
            compiler_params=pltpu.CompilerParams(
                dimension_semantics=("parallel", "arbitrary"),
                vmem_limit_bytes=int(vmem_limit),
            ),
        )

    args = (h_p, enc_p, wh_t, ws_t, bias, v_row)
    try:
        out = build(True)(*args)
    except Exception:
        # pipeline_mode=pl.Buffered is a newer knob; fall back to defaults.
        out = build(False)(*args)

    return out[:B, :L]


def attn_reference(hidden, encoder_outputs, params):
    """Pure-JAX reference mirroring the PyTorch forward exactly."""
    L = encoder_outputs.shape[0]
    h_exp = jnp.broadcast_to(hidden, (L,) + hidden.shape[1:])      # (L, B, H)
    wh = h_exp @ params['Wh_w'].T + params['Wh_b']
    ws = encoder_outputs @ params['Ws_w'].T + params['Ws_b']
    energy = jnp.tanh(wh + ws)                                     # (L, B, H)
    score = (energy @ params['v_w'].T + params['v_b'])[..., 0].T   # (B, L)
    return jax.nn.softmax(score, axis=1)


if __name__ == "__main__":
    # Small shapes consistent with the module (hidden_size kept small, lane aligned).
    H, B = 128, 32
    key = jax.random.PRNGKey(0)
    kp = jax.random.split(key, 6)
    params = {
        'Wh_w': jax.random.normal(kp[0], (H, H), jnp.float32) * 0.1,
        'Wh_b': jax.random.normal(kp[1], (H,), jnp.float32) * 0.1,
        'Ws_w': jax.random.normal(kp[2], (H, H), jnp.float32) * 0.1,
        'Ws_b': jax.random.normal(kp[3], (H,), jnp.float32) * 0.1,
        'v_w':  jax.random.normal(kp[4], (1, H), jnp.float32) * 0.1,
        'v_b':  jax.random.normal(kp[5], (1,), jnp.float32) * 0.1,
    }

    def run_case(L, atol, **kw):
        kh, ke = jax.random.split(jax.random.fold_in(key, L))
        hidden = jax.random.normal(kh, (1, B, H), jnp.float32)
        enc = jax.random.normal(ke, (L, B, H), jnp.float32)
        ref = attn_reference(hidden, enc, params)
        out = jax.block_until_ready(attn_forward(hidden, enc, params, **kw))
        assert out.shape == (B, L), out.shape
        assert jnp.allclose(out, ref, atol=atol, rtol=atol), \
            f"mismatch vs reference (L={L}, kw={kw})"
        assert jnp.allclose(jnp.sum(out, axis=1), jnp.ones((B,)), atol=1e-4), \
            f"rows do not sum to 1 (L={L}, kw={kw})"

    # 1) Ragged small L: single seq tile, lane-widened output, 2 batch grid steps.
    run_case(10, 2e-3, block_b=16)
    # 2) L spanning two seq tiles: carried score scratch + tail masking.
    run_case(144, 2e-3, block_b=16, block_l=128)
    # 3) bf16-in-HBM MXU operands (+ bf16 tanh off v5e), f32 softmax, looser tol.
    run_case(10, 3e-2, block_b=16, mxu_dtype=jnp.bfloat16)

    print("KERNEL_OK")
</pallas_src>

<mosaic_0001>
module attributes {stable_mosaic.version = 11 : i64} {
  func.func @_attn_kernel(%arg0: i32, %arg1: i32, %arg2: memref<16x128xf32, #tpu.memory_space<vmem>>, %arg3: memref<16x16x128xf32, #tpu.memory_space<vmem>>, %arg4: memref<128x128xf32, #tpu.memory_space<vmem>>, %arg5: memref<128x128xf32, #tpu.memory_space<vmem>>, %arg6: memref<1x128xf32, #tpu.memory_space<vmem>>, %arg7: memref<1x128xf32, #tpu.memory_space<vmem>>, %arg8: memref<16x128xf32, #tpu.memory_space<vmem>>, %arg9: memref<16x128xf32, #tpu.memory_space<vmem>>) attributes {dimension_semantics = [#tpu.dimension_semantics<parallel>, #tpu.dimension_semantics<arbitrary>], iteration_bounds = array<i64: 2, 1>, scalar_prefetch = 0 : i64, scratch_operands = 1 : i64, tpu.core_type = #tpu.core_type<tc>, window_params = [{transform_indices = @transform_0, window_bounds = array<i64: 16, 128>}, {transform_indices = @transform_1, window_bounds = array<i64: 16, 16, 128>}, {pipeline_mode = #tpu.pipeline_mode<synchronous>, transform_indices = @transform_2, window_bounds = array<i64: 128, 128>}, {pipeline_mode = #tpu.pipeline_mode<synchronous>, transform_indices = @transform_3, window_bounds = array<i64: 128, 128>}, {pipeline_mode = #tpu.pipeline_mode<synchronous>, transform_indices = @transform_4, window_bounds = array<i64: 1, 128>}, {pipeline_mode = #tpu.pipeline_mode<synchronous>, transform_indices = @transform_5, window_bounds = array<i64: 1, 128>}, {transform_indices = @transform_6, window_bounds = array<i64: 16, 128>}]} {
    %c0 = arith.constant 0 : index
    %c0_0 = arith.constant 0 : index
    %0 = vector.load %arg2[%c0, %c0_0] : memref<16x128xf32, #tpu.memory_space<vmem>>, vector<16x128xf32>
    %c0_1 = arith.constant 0 : index
    %c0_2 = arith.constant 0 : index
    %1 = vector.load %arg4[%c0_1, %c0_2] : memref<128x128xf32, #tpu.memory_space<vmem>>, vector<128x128xf32>
    %cst = arith.constant dense<0.000000e+00> : vector<16x128xf32>
    %2 = tpu.matmul %0, %1, %cst {dimension_numbers = #tpu.dot_dimension_numbers<[1], [0], [0], [1], [0, 0, 1, 1], [], []>} : vector<16x128xf32>, vector<128x128xf32>, vector<16x128xf32> -> vector<16x128xf32>
    %c0_3 = arith.constant 0 : index
    %c0_4 = arith.constant 0 : index
    %3 = vector.load %arg6[%c0_3, %c0_4] : memref<1x128xf32, #tpu.memory_space<vmem>>, vector<1x128xf32>
    %4 = vector.broadcast %3 : vector<1x128xf32> to vector<16x128xf32>
    %5 = arith.addf %2, %4 : vector<16x128xf32>
    %c0_5 = arith.constant 0 : index
    %c0_6 = arith.constant 0 : index
    %c0_7 = arith.constant 0 : index
    %6 = vector.load %arg3[%c0_5, %c0_6, %c0_7] : memref<16x16x128xf32, #tpu.memory_space<vmem>>, vector<16x16x128xf32>
    %7 = vector.shape_cast %6 : vector<16x16x128xf32> to vector<256x128xf32>
    %c0_8 = arith.constant 0 : index
    %c0_9 = arith.constant 0 : index
    %8 = vector.load %arg5[%c0_8, %c0_9] : memref<128x128xf32, #tpu.memory_space<vmem>>, vector<128x128xf32>
    %cst_10 = arith.constant dense<0.000000e+00> : vector<256x128xf32>
    %9 = tpu.matmul %7, %8, %cst_10 {dimension_numbers = #tpu.dot_dimension_numbers<[1], [0], [0], [1], [0, 0, 1, 1], [], []>} : vector<256x128xf32>, vector<128x128xf32>, vector<256x128xf32> -> vector<256x128xf32>
    %10 = vector.shape_cast %9 : vector<256x128xf32> to vector<16x16x128xf32>
    %11 = vector.shape_cast %5 : vector<16x128xf32> to vector<16x1x128xf32>
    %12 = vector.broadcast %11 : vector<16x1x128xf32> to vector<16x16x128xf32>
    %13 = arith.addf %10, %12 : vector<16x16x128xf32>
    %14 = math.tanh %13 : vector<16x16x128xf32>
    %c0_11 = arith.constant 0 : index
    %c0_12 = arith.constant 0 : index
    %15 = vector.load %arg7[%c0_11, %c0_12] : memref<1x128xf32, #tpu.memory_space<vmem>>, vector<1x128xf32>
    %16 = vector.shape_cast %15 : vector<1x128xf32> to vector<1x1x128xf32>
    %17 = vector.broadcast %16 : vector<1x1x128xf32> to vector<16x16x128xf32>
    %18 = arith.mulf %14, %17 : vector<16x16x128xf32>
    %cst_13 = arith.constant dense<0.000000e+00> : vector<16x16xf32>
    %19 = vector.multi_reduction <add>, %18, %cst_13 [2] : vector<16x16x128xf32> to vector<16x16xf32>
    %c16_i32 = arith.constant 16 : i32
    %20 = arith.muli %arg1, %c16_i32 : i32
    %21 = tpu.iota {dimensions = array<i32: 1>} : vector<16x16xi32>
    %22 = vector.broadcast %20 : i32 to vector<16x16xi32>
    %23 = arith.addi %22, %21 : vector<16x16xi32>
    %c10_i32 = arith.constant 10 : i32
    %24 = vector.broadcast %c10_i32 : i32 to vector<16x16xi32>
    %25 = arith.cmpi slt, %23, %24 : vector<16x16xi32>
    %cst_14 = arith.constant -1.000000e+30 : f32
    %26 = vector.broadcast %cst_14 : f32 to vector<16x16xf32>
    %27 = arith.select %25, %19, %26 : vector<16x16xi1>, vector<16x16xf32>
    %cst_15 = arith.constant -1.000000e+30 : f32
    %28 = vector.broadcast %cst_15 : f32 to vector<16x112xf32>
    %c0_16 = arith.constant 0 : index
    %c16 = arith.constant 16 : index
    %29 = vector.load %arg9[%c0_16, %c16] : memref<16x128xf32, #tpu.memory_space<vmem>>, vector<16x112xf32>
    tpu.vector_store %arg9[%c0_16, %c16], %28 {strides = array<i32>} : memref<16x128xf32, #tpu.memory_space<vmem>>, vector<16x112xf32>,
    %c0_17 = arith.constant 0 : index
    %c0_18 = arith.constant 0 : index
    %30 = vector.load %arg9[%c0_17, %c0_18] : memref<16x128xf32, #tpu.memory_space<vmem>>, vector<16x16xf32>
    tpu.vector_store %arg9[%c0_17, %c0_18], %27 {strides = array<i32>} : memref<16x128xf32, #tpu.memory_space<vmem>>, vector<16x16xf32>,
    %c0_19 = arith.constant 0 : index
    %c0_20 = arith.constant 0 : index
    %31 = vector.load %arg9[%c0_19, %c0_20] : memref<16x128xf32, #tpu.memory_space<vmem>>, vector<16x128xf32>
    %cst_21 = arith.constant dense<0xFF800000> : vector<16xf32>
    %32 = vector.multi_reduction <maximumf>, %31, %cst_21 [1] : vector<16x128xf32> to vector<16xf32>
    %33 = vector.shape_cast %32 : vector<16xf32> to vector<16x1xf32>
    %34 = vector.broadcast %33 : vector<16x1xf32> to vector<16x128xf32>
    %35 = arith.subf %31, %34 : vector<16x128xf32>
    %36 = math.exp %35 : vector<16x128xf32>
    %cst_22 = arith.constant dense<0.000000e+00> : vector<16xf32>
    %37 = vector.multi_reduction <add>, %36, %cst_22 [1] : vector<16x128xf32> to vector<16xf32>
    %38 = vector.shape_cast %37 : vector<16xf32> to vector<16x1xf32>
    %39 = vector.broadcast %38 : vector<16x1xf32> to vector<16x128xf32>
    %40 = arith.divf %36, %39 : vector<16x128xf32>
    %c0_23 = arith.constant 0 : index
    %c0_24 = arith.constant 0 : index
    %41 = vector.load %arg8[%c0_23, %c0_24] : memref<16x128xf32, #tpu.memory_space<vmem>>, vector<16x128xf32>
    tpu.vector_store %arg8[%c0_23, %c0_24], %40 {strides = array<i32>} : memref<16x128xf32, #tpu.memory_space<vmem>>, vector<16x128xf32>,
    return
  }
  func.func @transform_0(%arg0: i32, %arg1: i32) -> (i32, i32) {
    %c0_i32 = arith.constant 0 : i32
    %c0_i32_0 = arith.constant 0 : i32
    return %arg0, %c0_i32 : i32, i32
  }
  func.func @transform_1(%arg0: i32, %arg1: i32) -> (i32, i32, i32) {
    %c0_i32 = arith.constant 0 : i32
    %c0_i32_0 = arith.constant 0 : i32
    return %arg0, %arg1, %c0_i32 : i32, i32, i32
  }
  func.func @transform_2(%arg0: i32, %arg1: i32) -> (i32, i32) {
    %c0_i32 = arith.constant 0 : i32
    %c0_i32_0 = arith.constant 0 : i32
    %c0_i32_1 = arith.constant 0 : i32
    return %c0_i32, %c0_i32_0 : i32, i32
  }
  func.func @transform_3(%arg0: i32, %arg1: i32) -> (i32, i32) {
    %c0_i32 = arith.constant 0 : i32
    %c0_i32_0 = arith.constant 0 : i32
    %c0_i32_1 = arith.constant 0 : i32
    return %c0_i32, %c0_i32_0 : i32, i32
  }
  func.func @transform_4(%arg0: i32, %arg1: i32) -> (i32, i32) {
    %c0_i32 = arith.constant 0 : i32
    %c0_i32_0 = arith.constant 0 : i32
    %c0_i32_1 = arith.constant 0 : i32
    return %c0_i32, %c0_i32_0 : i32, i32
  }
  func.func @transform_5(%arg0: i32, %arg1: i32) -> (i32, i32) {
    %c0_i32 = arith.constant 0 : i32
    %c0_i32_0 = arith.constant 0 : i32
    %c0_i32_1 = arith.constant 0 : i32
    return %c0_i32, %c0_i32_0 : i32, i32
  }
  func.func @transform_6(%arg0: i32, %arg1: i32) -> (i32, i32) {
    %c0_i32 = arith.constant 0 : i32
    %c0_i32_0 = arith.constant 0 : i32
    return %arg0, %c0_i32 : i32, i32
  }
}

module attributes {stable_mosaic.version = 11 : i64} {
  func.func @_attn_kernel(%arg0: i32, %arg1: i32, %arg2: memref<16x128xf32, #tpu.memory_space<vmem>>, %arg3: memref<16x16x128xf32, #tpu.memory_space<vmem>>, %arg4: memref<128x128xf32, #tpu.memory_space<vmem>>, %arg5: memref<128x128xf32, #tpu.memory_space<vmem>>, %arg6: memref<1x128xf32, #tpu.memory_space<vmem>>, %arg7: memref<1x128xf32, #tpu.memory_space<vmem>>, %arg8: memref<16x128xf32, #tpu.memory_space<vmem>>, %arg9: memref<16x128xf32, #tpu.memory_space<vmem>>) attributes {dimension_semantics = [#tpu.dimension_semantics<parallel>, #tpu.dimension_semantics<arbitrary>], iteration_bounds = array<i64: 2, 1>, scalar_prefetch = 0 : i64, scratch_operands = 1 : i64, tpu.core_type = #tpu.core_type<tc>, window_params = [{transform_indices = @transform_0, window_bounds = array<i64: 16, 128>}, {transform_indices = @transform_1, window_bounds = array<i64: 16, 16, 128>}, {pipeline_mode = #tpu.pipeline_mode<synchronous>, transform_indices = @transform_2, window_bounds = array<i64: 128, 128>}, {pipeline_mode = #tpu.pipeline_mode<synchronous>, transform_indices = @transform_3, window_bounds = array<i64: 128, 128>}, {pipeline_mode = #tpu.pipeline_mode<synchronous>, transform_indices = @transform_4, window_bounds = array<i64: 1, 128>}, {pipeline_mode = #tpu.pipeline_mode<synchronous>, transform_indices = @transform_5, window_bounds = array<i64: 1, 128>}, {transform_indices = @transform_6, window_bounds = array<i64: 16, 128>}]} {
    %c0 = arith.constant 0 : index
    %c0_0 = arith.constant 0 : index
    %0 = vector.load %arg2[%c0, %c0_0] : memref<16x128xf32, #tpu.memory_space<vmem>>, vector<16x128xf32>
    %c0_1 = arith.constant 0 : index
    %c0_2 = arith.constant 0 : index
    %1 = vector.load %arg4[%c0_1, %c0_2] : memref<128x128xf32, #tpu.memory_space<vmem>>, vector<128x128xf32>
    %cst = arith.constant dense<0.000000e+00> : vector<16x128xf32>
    %2 = tpu.matmul %0, %1, %cst {dimension_numbers = #tpu.dot_dimension_numbers<[1], [0], [0], [1], [0, 0, 1, 1], [], []>} : vector<16x128xf32>, vector<128x128xf32>, vector<16x128xf32> -> vector<16x128xf32>
    %c0_3 = arith.constant 0 : index
    %c0_4 = arith.constant 0 : index
    %3 = vector.load %arg6[%c0_3, %c0_4] : memref<1x128xf32, #tpu.memory_space<vmem>>, vector<1x128xf32>
    %4 = vector.broadcast %3 : vector<1x128xf32> to vector<16x128xf32>
    %5 = arith.addf %2, %4 : vector<16x128xf32>
    %c0_5 = arith.constant 0 : index
    %c0_6 = arith.constant 0 : index
    %c0_7 = arith.constant 0 : index
    %6 = vector.load %arg3[%c0_5, %c0_6, %c0_7] : memref<16x16x128xf32, #tpu.memory_space<vmem>>, vector<16x16x128xf32>
    %7 = vector.shape_cast %6 : vector<16x16x128xf32> to vector<256x128xf32>
    %c0_8 = arith.constant 0 : index
    %c0_9 = arith.constant 0 : index
    %8 = vector.load %arg5[%c0_8, %c0_9] : memref<128x128xf32, #tpu.memory_space<vmem>>, vector<128x128xf32>
    %cst_10 = arith.constant dense<0.000000e+00> : vector<256x128xf32>
    %9 = tpu.matmul %7, %8, %cst_10 {dimension_numbers = #tpu.dot_dimension_numbers<[1], [0], [0], [1], [0, 0, 1, 1], [], []>} : vector<256x128xf32>, vector<128x128xf32>, vector<256x128xf32> -> vector<256x128xf32>
    %10 = vector.shape_cast %9 : vector<256x128xf32> to vector<16x16x128xf32>
    %11 = vector.shape_cast %5 : vector<16x128xf32> to vector<16x1x128xf32>
    %12 = vector.broadcast %11 : vector<16x1x128xf32> to vector<16x16x128xf32>
    %13 = arith.addf %10, %12 : vector<16x16x128xf32>
    %14 = math.tanh %13 : vector<16x16x128xf32>
    %c0_11 = arith.constant 0 : index
    %c0_12 = arith.constant 0 : index
    %15 = vector.load %arg7[%c0_11, %c0_12] : memref<1x128xf32, #tpu.memory_space<vmem>>, vector<1x128xf32>
    %16 = vector.shape_cast %15 : vector<1x128xf32> to vector<1x1x128xf32>
    %17 = vector.broadcast %16 : vector<1x1x128xf32> to vector<16x16x128xf32>
    %18 = arith.mulf %14, %17 : vector<16x16x128xf32>
    %cst_13 = arith.constant dense<0.000000e+00> : vector<16x16xf32>
    %19 = vector.multi_reduction <add>, %18, %cst_13 [2] : vector<16x16x128xf32> to vector<16x16xf32>
    %c16_i32 = arith.constant 16 : i32
    %20 = arith.muli %arg1, %c16_i32 : i32
    %21 = tpu.iota {dimensions = array<i32: 1>} : vector<16x16xi32>
    %22 = vector.broadcast %20 : i32 to vector<16x16xi32>
    %23 = arith.addi %22, %21 : vector<16x16xi32>
    %c10_i32 = arith.constant 10 : i32
    %24 = vector.broadcast %c10_i32 : i32 to vector<16x16xi32>
    %25 = arith.cmpi slt, %23, %24 : vector<16x16xi32>
    %cst_14 = arith.constant -1.000000e+30 : f32
    %26 = vector.broadcast %cst_14 : f32 to vector<16x16xf32>
    %27 = arith.select %25, %19, %26 : vector<16x16xi1>, vector<16x16xf32>
    %cst_15 = arith.constant -1.000000e+30 : f32
    %28 = vector.broadcast %cst_15 : f32 to vector<16x112xf32>
    %c0_16 = arith.constant 0 : index
    %c16 = arith.constant 16 : index
    %29 = vector.load %arg9[%c0_16, %c16] : memref<16x128xf32, #tpu.memory_space<vmem>>, vector<16x112xf32>
    tpu.vector_store %arg9[%c0_16, %c16], %28 {strides = array<i32>} : memref<16x128xf32, #tpu.memory_space<vmem>>, vector<16x112xf32>,
    %c0_17 = arith.constant 0 : index
    %c0_18 = arith.constant 0 : index
    %30 = vector.load %arg9[%c0_17, %c0_18] : memref<16x128xf32, #tpu.memory_space<vmem>>, vector<16x16xf32>
    tpu.vector_store %arg9[%c0_17, %c0_18], %27 {strides = array<i32>} : memref<16x128xf32, #tpu.memory_space<vmem>>, vector<16x16xf32>,
    %c0_19 = arith.constant 0 : index
    %c0_20 = arith.constant 0 : index
    %31 = vector.load %arg9[%c0_19, %c0_20] : memref<16x128xf32, #tpu.memory_space<vmem>>, vector<16x128xf32>
    %cst_21 = arith.constant dense<0xFF800000> : vector<16xf32>
    %32 = vector.multi_reduction <maximumf>, %31, %cst_21 [1] : vector<16x128xf32> to vector<16xf32>
    %33 = vector.shape_cast %32 : vector<16xf32> to vector<16x1xf32>
    %34 = vector.broadcast %33 : vector<16x1xf32> to vector<16x128xf32>
    %35 = arith.subf %31, %34 : vector<16x128xf32>
    %36 = math.exp %35 : vector<16x128xf32>
    %cst_22 = arith.constant dense<0.000000e+00> : vector<16xf32>
    %37 = vector.multi_reduction <add>, %36, %cst_22 [1] : vector<16x128xf32> to vector<16xf32>
    %38 = vector.shape_cast %37 : vector<16xf32> to vector<16x1xf32>
    %39 = vector.broadcast %38 : vector<16x1xf32> to vector<16x128xf32>
    %40 = arith.divf %36, %39 : vector<16x128xf32>
    %c0_23 = arith.constant 0 : index
    %c0_24 = arith.constant 0 : index
    %41 = vector.load %arg8[%c0_23, %c0_24] : memref<16x128xf32, #tpu.memory_space<vmem>>, vector<16x128xf32>
    tpu.vector_store %arg8[%c0_23, %c0_24], %40 {strides = array<i32>} : memref<16x128xf32, #tpu.memory_space<vmem>>, vector<16x128xf32>,
    return
  }
  func.func @transform_0(%arg0: i32, %arg1: i32) -> (i32, i32) {
    %c0_i32 = arith.constant 0 : i32
    %c0_i32_0 = arith.constant 0 : i32
    return %arg0, %c0_i32 : i32, i32
  }
  func.func @transform_1(%arg0: i32, %arg1: i32) -> (i32, i32, i32) {
    %c0_i32 = arith.constant 0 : i32
    %c0_i32_0 = arith.constant 0 : i32
    return %arg0, %arg1, %c0_i32 : i32, i32, i32
  }
  func.func @transform_2(%arg0: i32, %arg1: i32) -> (i32, i32) {
    %c0_i32 = arith.constant 0 : i32
    %c0_i32_0 = arith.constant 0 : i32
    %c0_i32_1 = arith.constant 0 : i32
    return %c0_i32, %c0_i32_0 : i32, i32
  }
  func.func @transform_3(%arg0: i32, %arg1: i32) -> (i32, i32) {
    %c0_i32 = arith.constant 0 : i32
    %c0_i32_0 = arith.constant 0 : i32
    %c0_i32_1 = arith.constant 0 : i32
    return %c0_i32, %c0_i32_0 : i32, i32
  }
  func.func @transform_4(%arg0: i32, %arg1: i32) -> (i32, i32) {
    %c0_i32 = arith.constant 0 : i32
    %c0_i32_0 = arith.constant 0 : i32
    %c0_i32_1 = arith.constant 0 : i32
    return %c0_i32, %c0_i32_0 : i32, i32
  }
  func.func @transform_5(%arg0: i32, %arg1: i32) -> (i32, i32) {
    %c0_i32 = arith.constant 0 : i32
    %c0_i32_0 = arith.constant 0 : i32
    %c0_i32_1 = arith.constant 0 : i32
    return %c0_i32, %c0_i32_0 : i32, i32
  }
  func.func @transform_6(%arg0: i32, %arg1: i32) -> (i32, i32) {
    %c0_i32 = arith.constant 0 : i32
    %c0_i32_0 = arith.constant 0 : i32
    return %arg0, %c0_i32 : i32, i32
  }
}

</mosaic_0001>

<bundles_post_ra>
// kernel: tpu_custom_call.1
= control target key start
LH: loop header
LB: loop body
LE: loop exit
PB: predicated region body
PF: predicated region fallthrough
CT: control target
= control target key end

     0   :  { %s2051_s0 = inlined_call_operand.hbm [shape: f32[32,128], index: 0, kind: input, shape index: {}]   ;;  %s2052_s1 = inlined_call_operand.hbm [shape: f32[32,16,128], index: 1, kind: input, shape index: {}]   ;;  %s2053_s2 = inlined_call_operand.hbm [shape: f32[128,128], index: 2, kind: input, shape index: {}]   ;;  %s2054_s3 = inlined_call_operand.hbm [shape: f32[128,128], index: 3, kind: input, shape index: {}]   ;;  %s2055_s4 = inlined_call_operand.vmem [shape: f32[1,128], index: 4, kind: input, shape index: {}]   ;;  %s2056_s5 = inlined_call_operand.vmem [shape: f32[1,128], index: 5, kind: input, shape index: {}]   ;;  %s2057_s6 = inlined_call_operand.hbm [shape: f32[32,128], index: 6, kind: output, shape index: {}]  }
   0x1   :  { %2066 = sst [smem:[#allocation22_spill]] %s2053_s2 }
   0x2   :  { %2067 = sst [smem:[#allocation23_spill]] %s2054_s3 }
   0x3   :  { %11 = vsyncpa [#allocation4], 0 }
   0x4   :  { %13 = vsyncpa [#allocation4 + $0x1], 0 }
   0x5   :  { %14 = vsyncpa [#allocation7], 0 }
   0x6   :  { %16 = vsyncpa [#allocation7 + $0x1], 0 }
   0x7   :  { %17 = vsyncpa [#allocation10], 0 }
   0x8   :  { %18 = vsyncpa [#allocation5], 0 }
   0x9   :  { %20 = vsyncpa [#allocation5 + $0x1], 0  ;;  %s1596_s21 = smov 0   ;;  %s1598_s22 = smov 0  }
   0xa   :  { %s1600_s23 = smov 0   ;;  %s1602_s24 = smov 0  }
   0xb   :  { %s1604_s25 = smov 0   ;;  %s1606_s26 = smov 0  }
   0xc LB: > { %2068 = sst [smem:[#allocation17_spill]] %s1532_s21  ;;  %s1627_s27 = sadd.s32 4294967295, %s1552_s26   ;;  %s1552_s26 = sphi %s1606_s26, %s26_s26   ;;  %s1548_s25 = sphi %s1604_s25, %s2090_s25   ;;  %s1544_s24 = sphi %s1602_s24, %s2089_s24   ;;  %s1540_s23 = sphi %s1600_s23, %s2085_s23   ;;  %s1536_s22 = sphi %s1598_s22, %s2088_s22   ;;  %s1532_s21 = sphi %s1596_s21, %s2087_s21  }
   0xd   : > { %2069 = sst [smem:[#allocation18_spill]] %s1540_s23  ;;  %s1096_s28 = sadd.s32 4294967294, %s1552_s26  }
   0xe   : > { %p58_p0 = scmp.ne.s32.totalorder %s1536_s22, %s1532_s21  ;;  %p59_p1 = scmp.eq.s32.totalorder %s1627_s27, 0 }
   0xf   : > { %p194_p2 = scmp.eq.s32.totalorder %s1627_s27, 1  ;;  %p200_p3 = scmp.eq.s32.totalorder %s1096_s28, 1 }
  0x10   : > { %p1636_p4 = por %p59_p1, %p58_p0  ;;  %p1097_p5 = scmp.ge.s32.totalorder %s1552_s26, 1 }
  0x11   : > { %p1641_p6 = por %p200_p3, %p58_p0  ;;  %p207_p7 = scmp.lt.s32.totalorder %s1552_s26, 3 }
  0x12   : > { %s2073_s2 = sld [smem:[#allocation22_spill]]  ;;  %s1554_s11 = smov [#allocation8]  }
  0x13   : > { %s2071_s30 = scalar_select %p1641_p6, 1, 0 }
  0x14   : > { %p1649_p8 = pnand %p1097_p5, %p207_p7  ;;  %s220_s12 = sshll.u32 %s1554_s11, 4  ;;  %s221_s12 = int_to_ptr.vmem [resolvable:$true] %s220_s12 }
  0x15   : > { %2072 = sst [smem:[#allocation19_spill]] %s2071_s30  ;;  %p1100_p11 = scmp.ge.s32.totalorder %s1552_s26, 2 }
  0x16   : > { %p1185_p9 = pneg %p1649_p8  ;;  %s2075_s3 = sld [smem:[#allocation23_spill]] }
  0x17   : > { %s2058_s16 = smov 128   ;;  %s2060_s17 = smov 8  }
  0x18   : > { %s218_s9 = sshll.u32 %s2073_s2, 4  ;;  %p1186_p10 = pnand %p1185_p9, %p59_p1  ;;  %s219_s9 = int_to_ptr.hbm [resolvable:$true] %s218_s9 }
  0x19   : > { %s1557_s18 = smov [#allocation9]   ;;  %s38_s20 = sadd.s32 1, %s1548_s25 }
  0x1a   : > { %1188 = dma.hbm_to_vmem [thread:$0]  (!%p1186_p10), %s219_s9, 2048, %s221_s12, [#allocation7], %s2058_s16, %s2058_s16, %s2060_s17  }
  0x1b   : > { %s234_s19 = sshll.u32 %s1557_s18, 4  ;;  %s45_s28 = sadd.s32 1, %s1540_s23  ;;  %s235_s19 = int_to_ptr.vmem [resolvable:$true] %s234_s19 }
  0x1c   : > { %s232_s15 = sshll.u32 %s2075_s3, 4  ;;  %p40_p12 = scmp.ge.s32.totalorder %s38_s20, 2  ;;  %s233_s15 = int_to_ptr.hbm [resolvable:$true] %s232_s15 }
  0x1d   : > { %1191 = dma.hbm_to_vmem [thread:$0]  (!%p1186_p10), %s233_s15, 2048, %s235_s19, [#allocation10], %s2058_s16, %s2058_s16, %s2060_s17  }
  0x1e   : > { %p52_p13 = scmp.ne.s32.totalorder %s1540_s23, %s1536_s22  ;;  %p53_p0 = scmp.eq.s32.totalorder %s1552_s26, 0 }
  0x1f   : > { %p1205_p3 = scmp.lt.s32.totalorder %s1552_s26, 2  ;;  %s2092_s20 = smov (%p40_p12, %s38_s20), 0 }
  0x20   : > { %2076 = sst [smem:[#allocation20_spill]] %s2092_s20  ;;  %p1675_p5 = por %p53_p0, %p52_p13 }
  0x21   : > { %p1681_p7 = por %p194_p2, %p52_p13  ;;  %s42_s9 = ssub.s32 %s1548_s25, %s2092_s20 }
  0x22   : > { %s254_s11 = sand.u32 1, %s1540_s23   ;;  %p43_p9 = scmp.eq.s32.totalorder %s42_s9, 0 }
  0x23   : > { %s1101_s12 = sshll.u32 %s254_s11, 4  ;;  %s1119_s13 = sshll.u32 %s1548_s25, 4 }
  0x24   : > { %s1690_s14 = scalar_select %p43_p9, %s1540_s23, %s45_s28  }
  0x25   : > { %s263_s19 = scalar_lea.hbm %s2051_s0, %s1119_s13  ;;  %s258_s17 = scalar_lea.vmem [#allocation3], %s1101_s12 }
  0x26   : > { %2079 = sst [smem:[#allocation21_spill]] %s1690_s14  ;;  %s264_s16 = sshll.u32 %s263_s19, 4  ;;  %s265_s16 = int_to_ptr.hbm [resolvable:$true] %s264_s16 }
  0x27   : > { %s266_s2 = sshll.u32 %s258_s17, 4  ;;  %p1193_p2 = pnand %p1205_p3, %p1675_p5  ;;  %s267_s2 = int_to_ptr.vmem [resolvable:$true] %s266_s2 }
  0x28   : > { %s276_s3 = sand.u32 1, %s1552_s26   ;;  %s1104_s20 = sshll.u32 %s254_s11, 8 }
  0x29   : > { %s255_s30 = scalar_lea.sflag [#allocation4], %s254_s11  ;;  %s2080_s9 = smov 8  }
  0x2a   : > { %s2081_s21 = smov 128   ;;  %s1121_s28 = sshll.u32 %s1548_s25, 8 }
  0x2b   : > { %1195 = dma.hbm_to_vmem [thread:$0]  (!%p1193_p2), %s265_s16, 256, %s267_s2, %s255_s30, %s2081_s21, %s2081_s21, %s2080_s9  }
  0x2c   : > { %s280_s14 = scalar_lea.vmem [#allocation6], %s1104_s20  ;;  %s288_s12 = scalar_lea.hbm %s2052_s1, %s1121_s28 }
  0x2d   : > { %s291_s23 = sshll.u32 %s280_s14, 4  ;;  %s289_s17 = sshll.u32 %s288_s12, 4  ;;  %s292_s23 = int_to_ptr.vmem [resolvable:$true] %s291_s23  ;;  %s290_s17 = int_to_ptr.hbm [resolvable:$true] %s289_s17 }
  0x2e   : > { %s277_s7 = scalar_lea.sflag [#allocation7], %s276_s3  ;;  %303 = sbr.rel (%p1649_p8) target bundleno = 720 (0x2d0), region = 44 }
  0x2f   : > { %1198 = dma.hbm_to_vmem [thread:$0]  (!%p1193_p2), %s290_s17, 4096, %s292_s23, %s277_s7, %s2081_s21, %s2081_s21, %s2080_s9  }
  0x30   : > { %s1713_s2 = sand.u32 (!%p1649_p8), 1, %s1536_s22  }
  0x31   : > { %s1109_s30 = sshll.u32 (!%p1649_p8), %s1713_s2, 4  ;;  %s306_s16 = scalar_lea.sflag (!%p1649_p8), [#allocation4], %s1713_s2 }
  0x32   : > { %s1719_s20 = scalar_lea.vmem (!%p1649_p8), [#allocation3], %s1109_s30 }
  0x33   : > { %1511 = dma.done.wait (%p1636_p4), %s306_s16, 256  }
  0x34   : > { %1513 = vsyncadd (%p1636_p4), %s306_s16, 4294967040  ;;  %s315_s3 = sand.u32 1, %s1627_s27   ;;  %s1110_s21 = sshll.u32 %s1713_s2, 8 }
  0x35   : > { %s316_s23 = scalar_lea.sflag [#allocation7], %s315_s3  ;;  %s1727_s10 = scalar_lea.vmem [#allocation6], %s1110_s21 }
  0x36   : > { %1515 = dma.done.wait (%p1636_p4), %s316_s23, 4096  }
  0x37   : > { %1517 = vsyncadd (%p1636_p4), %s316_s23, 4294963200 }
  0x38   : > { %1519 = dma.done.wait (%p59_p1), [#allocation7], 2048  }
  0x39   : > { %1521 = vsyncadd (%p59_p1), [#allocation7], 4294965248 }
  0x3a   : > { %1523 = dma.done.wait (%p59_p1), [#allocation10], 2048  }
  0x3b   : > { %1525 = vsyncadd (%p59_p1), [#allocation10], 4294965248  ;;  %v385_v0 = vld [vmem:[#allocation8 + $0x78] sm:$0xff]  ;;  %v384_v2 = vld [vmem:[#allocation8 + $0x70] sm:$0xff]  ;;  %vm827_vm0 = vcmask 130112   ;;  %vm899_vm1 = vcmask 1047680  }
  0x3c   : > { %v1741_v1 = vld [vmem:[#allocation9 + $0x78] sm:$0xff]  ;;  %390 = vmatpush.msra.mxu0 %v385_v0  ;;  %v1744_v3 = vld [vmem:[#allocation9 + $0x70] sm:$0xff]  ;;  %v383_v4 = vld [vmem:[#allocation8 + $0x68] sm:$0xff]  ;;  %vm874_vm2 = vcmask 1041409   ;;  %vm876_vm3 = vcmask 1042434   ;;  %vm878_vm4 = vcmask 1043459  }
  0x3d   : > { %1123 = vmatpush.msra.mxu1 %v1741_v1  ;;  %1124 = vmatpush.msra.mxu2 %v1741_v1  ;;  %v1748_v5 = vld [vmem:[#allocation9 + $0x68] sm:$0xff]  ;;  %v382_v6 = vld [vmem:[#allocation8 + $0x60] sm:$0xff]  ;;  %v381_v8 = vld [vmem:[#allocation8 + $0x58] sm:$0xff]  ;;  %vm880_vm5 = vcmask 1044484   ;;  %vm882_vm6 = vcmask 1045509   ;;  %vm884_vm7 = vcmask 1046534  }
  0x3e   : > { %1125 = vmatpush.msra.mxu3 %v1741_v1  ;;  %391 = vmatpush.msra.mxu0 %v384_v2  ;;  %v1753_v7 = vld [vmem:[#allocation9 + $0x60] sm:$0xff]  ;;  %v1758_v9 = vld [vmem:[#allocation9 + $0x58] sm:$0xff]  ;;  %v380_v10 = vld [vmem:[#allocation8 + $0x50] sm:$0xff]  ;;  %vm886_vm8 = vcmask 1047559   ;;  %vm902_vm10 = vcmask 130048   ;;  %s1122_s18 = sshll.u32 %s1544_s24, 4 }
  0x3f   : > { %1126 = vmatpush.msra.mxu1 %v1744_v3  ;;  %1127 = vmatpush.msra.mxu2 %v1744_v3  ;;  %v1763_v11 = vld [vmem:[#allocation9 + $0x50] sm:$0xff]  ;;  %v379_v12 = vld [vmem:[#allocation8 + $0x48] sm:$0xff]  ;;  %v378_v14 = vld [vmem:[#allocation8 + $0x40] sm:$0xff]  ;;  %s965_s28 = scalar_lea.hbm %s2057_s6, %s1122_s18  ;;  %s363_s24 = scalar_lea.vmem [#allocation11], %s1109_s30 }
  0x40   : > { %1128 = vmatpush.msra.mxu3 %v1744_v3  ;;  %392 = vmatpush.msra.mxu0 %v383_v4  ;;  %v1768_v13 = vld [vmem:[#allocation9 + $0x48] sm:$0xff]  ;;  %v1773_v15 = vld [vmem:[#allocation9 + $0x40] sm:$0xff]  ;;  %v377_v16 = vld [vmem:[#allocation8 + $0x38] sm:$0xff]  ;;  %s966_s15 = sshll.u32 %s363_s24, 4  ;;  %s968_s13 = sshll.u32 %s965_s28, 4  ;;  %s967_s15 = int_to_ptr.vmem [resolvable:$true] %s966_s15  ;;  %s969_s13 = int_to_ptr.hbm [resolvable:$true] %s968_s13 }
  0x41   : > { %1129 = vmatpush.msra.mxu1 %v1748_v5  ;;  %1130 = vmatpush.msra.mxu2 %v1748_v5  ;;  %v1778_v17 = vld [vmem:[#allocation9 + $0x38] sm:$0xff]  ;;  %v376_v18 = vld [vmem:[#allocation8 + $0x30] sm:$0xff]  ;;  %v375_v20 = vld [vmem:[#allocation8 + $0x28] sm:$0xff]  ;;  %s954_s12 = scalar_lea.sflag [#allocation5], %s1713_s2  ;;  %s1472_s17 = sshra.s32 %s969_s13, 4  ;;  %s1473_s17 = int_to_ptr.hbm [resolvable:$true] %s1472_s17 }
  0x42   : > { %1131 = vmatpush.msra.mxu3 %v1748_v5  ;;  %393 = vmatpush.msra.mxu0 %v382_v6  ;;  %v1783_v19 = vld [vmem:[#allocation9 + $0x30] sm:$0xff]  ;;  %v1788_v21 = vld [vmem:[#allocation9 + $0x28] sm:$0xff]  ;;  %v374_v22 = vld [vmem:[#allocation8 + $0x20] sm:$0xff]  ;;  %s1474_s7 = scalar_lea.hbm %s1473_s17, 16  ;;  %p1479_p10 = scmp.lt.s32.totalorder %s1473_s17, %s2057_s6 }
  0x43   : > { %1132 = vmatpush.msra.mxu1 %v1753_v7  ;;  %1133 = vmatpush.msra.mxu2 %v1753_v7  ;;  %v1793_v23 = vld [vmem:[#allocation9 + $0x20] sm:$0xff]  ;;  %v373_v24 = vld [vmem:[#allocation8 + $0x18] sm:$0xff]  ;;  %v372_v26 = vld [vmem:[#allocation8 + $0x10] sm:$0xff]  ;;  %p1475_p1 = scmp.ne.s32.totalorder %s1473_s17, %s1474_s7 }
  0x44   : > { %1134 = vmatpush.msra.mxu3 %v1753_v7  ;;  %394 = vmatpush.msra.mxu0 %v381_v8  ;;  %v1798_v25 = vld [vmem:[#allocation9 + $0x18] sm:$0xff]  ;;  %v447_v27 = vld [vmem:[#allocation9 + $0x10] sm:$0xff]  ;;  %v371_v28 = vld [vmem:[#allocation8 + $0x8] sm:$0xff] }
  0x45   : > { %1135 = vmatpush.msra.mxu1 %v1758_v9  ;;  %1136 = vmatpush.msra.mxu2 %v1758_v9  ;;  %v446_v29 = vld [vmem:[#allocation9 + $0x8] sm:$0xff]  ;;  %v370_v30 = vld [vmem:[#allocation8] sm:$0xff]  ;;  %v427_v34 = vld [vmem:[%s1727_s10 + $0x70] sm:$0xff]  ;;  %p1476_p4 = pnand %p1475_p1, %p1681_p7 }
  0x46   : > { %1137 = vmatpush.msra.mxu3 %v1758_v9  ;;  %395 = vmatpush.msra.mxu0 %v380_v10  ;;  %v445_v31 = vld [vmem:[#allocation9] sm:$0xff]  ;;  %v418_v33 = vld [vmem:[%s1727_s10 + $0x28] sm:$0xff]  ;;  %v436_v35 = vld [vmem:[%s1727_s10 + $0xb8] sm:$0xff] }
  0x47   : > { %1138 = vmatpush.msra.mxu1 %v1763_v11  ;;  %1139 = vmatpush.msra.mxu2 %v1763_v11  ;;  %v368_v32 = vld [vmem:[%s1719_s20] sm:$0xff]  ;;  %v369_v36 = vld [vmem:[%s1719_s20 + $0x8] sm:$0xff]  ;;  %p1477_p8 = pneg %p1476_p4  ;;  %s1478_s20 = scalar_lea.hbm %s2057_s6, 32 }
  0x48   : > { %1140 = vmatpush.msra.mxu3 %v1763_v11  ;;  %396 = vmatpush.msra.mxu0 %v379_v12  ;;  %v419_v37 = vld [vmem:[%s1727_s10 + $0x30] sm:$0xff]  ;;  %v428_v38 = vld [vmem:[%s1727_s10 + $0x78] sm:$0xff]  ;;  %v437_v39 = vld [vmem:[%s1727_s10 + $0xc0] sm:$0xff]  ;;  %p1480_p12 = scmp.lt.s32.totalorder %s1478_s20, %s1474_s7 }
  0x49   : > { %1141 = vmatpush.msra.mxu1 %v1768_v13  ;;  %1142 = vmatpush.msra.mxu2 %v1768_v13  ;;  %v420_v40 = vld [vmem:[%s1727_s10 + $0x38] sm:$0xff]  ;;  %v429_v41 = vld [vmem:[%s1727_s10 + $0x80] sm:$0xff]  ;;  %v438_v42 = vld [vmem:[%s1727_s10 + $0xc8] sm:$0xff] }
  0x4a   : > { %1143 = vmatpush.msra.mxu3 %v1768_v13  ;;  %397 = vmatpush.msra.mxu0 %v378_v14  ;;  %v421_v43 = vld [vmem:[%s1727_s10 + $0x40] sm:$0xff]  ;;  %v430_v44 = vld [vmem:[%s1727_s10 + $0x88] sm:$0xff]  ;;  %v439_v45 = vld [vmem:[%s1727_s10 + $0xd0] sm:$0xff]  ;;  %p1481_p13 = por %p1480_p12, %p1479_p10 }
  0x4b   : > { %1144 = vmatpush.msra.mxu1 %v1773_v15  ;;  %1145 = vmatpush.msra.mxu2 %v1773_v15  ;;  %v413_v46 = vld [vmem:[%s1727_s10] sm:$0xff]  ;;  %v422_v47 = vld [vmem:[%s1727_s10 + $0x48] sm:$0xff]  ;;  %v431_v48 = vld [vmem:[%s1727_s10 + $0x90] sm:$0xff] }
  0x4c   : > { %1146 = vmatpush.msra.mxu3 %v1773_v15  ;;  %398 = vmatpush.msra.mxu0 %v377_v16  ;;  %v440_v49 = vld [vmem:[%s1727_s10 + $0xd8] sm:$0xff]  ;;  %v414_v50 = vld [vmem:[%s1727_s10 + $0x8] sm:$0xff]  ;;  %v423_v51 = vld [vmem:[%s1727_s10 + $0x50] sm:$0xff]  ;;  %p1482_p0 = pnand %p1481_p13, %p1477_p8 }
  0x4d   : > { %1147 = vmatpush.msra.mxu1 %v1778_v17  ;;  %1148 = vmatpush.msra.mxu2 %v1778_v17  ;;  %v432_v52 = vld [vmem:[%s1727_s10 + $0x98] sm:$0xff]  ;;  %v441_v53 = vld [vmem:[%s1727_s10 + $0xe0] sm:$0xff]  ;;  %v415_v54 = vld [vmem:[%s1727_s10 + $0x10] sm:$0xff] }
  0x4e   : > { %1149 = vmatpush.msra.mxu3 %v1778_v17  ;;  %399 = vmatpush.msra.mxu0 %v376_v18  ;;  %v424_v55 = vld [vmem:[%s1727_s10 + $0x58] sm:$0xff]  ;;  %v433_v56 = vld [vmem:[%s1727_s10 + $0xa0] sm:$0xff]  ;;  %v442_v57 = vld [vmem:[%s1727_s10 + $0xe8] sm:$0xff] }
  0x4f   : > { %1150 = vmatpush.msra.mxu1 %v1783_v19  ;;  %1151 = vmatpush.msra.mxu2 %v1783_v19  ;;  %v416_v58 = vld [vmem:[%s1727_s10 + $0x18] sm:$0xff]  ;;  %v425_v59 = vld [vmem:[%s1727_s10 + $0x60] sm:$0xff]  ;;  %v434_v60 = vld [vmem:[%s1727_s10 + $0xa8] sm:$0xff] }
  0x50   : > { %1152 = vmatpush.msra.mxu3 %v1783_v19  ;;  %400 = vmatpush.msra.mxu0 %v375_v20  ;;  %v443_v61 = vld [vmem:[%s1727_s10 + $0xf0] sm:$0xff]  ;;  %v417_v62 = vld [vmem:[%s1727_s10 + $0x20] sm:$0xff]  ;;  %v426_v63 = vld [vmem:[%s1727_s10 + $0x68] sm:$0xff] }
  0x51   : > { %1153 = vmatpush.msra.mxu1 %v1788_v21  ;;  %1154 = vmatpush.msra.mxu2 %v1788_v21  ;;  %v435_v0 = vld [vmem:[%s1727_s10 + $0xb0] sm:$0xff] }
  0x52   : > { %1155 = vmatpush.msra.mxu3 %v1788_v21  ;;  %401 = vmatpush.msra.mxu0 %v374_v22  ;;  %v1264_v2 = vld [vmem:[%s2055_s4] ss:$0 sm:$0xff] }
  0x53   : > { %1156 = vmatpush.msra.mxu1 %v1793_v23  ;;  %1157 = vmatpush.msra.mxu2 %v1793_v23 }
  0x54   : > { %1158 = vmatpush.msra.mxu3 %v1793_v23  ;;  %402 = vmatpush.msra.mxu0 %v373_v24 }
  0x55   : > { %1159 = vmatpush.msra.mxu1 %v1798_v25  ;;  %1160 = vmatpush.msra.mxu2 %v1798_v25 }
  0x56   : > { %1161 = vmatpush.msra.mxu3 %v1798_v25  ;;  %403 = vmatpush.msra.mxu0 %v372_v26 }
  0x57   : > { %1162 = vmatpush.msra.mxu1 %v447_v27  ;;  %1163 = vmatpush.msra.mxu2 %v447_v27 }
  0x58   : > { %1164 = vmatpush.msra.mxu3 %v447_v27  ;;  %404 = vmatpush.msra.mxu0 %v371_v28 }
  0x59   : > { %1165 = vmatpush.msra.mxu1 %v446_v29  ;;  %1166 = vmatpush.msra.mxu2 %v446_v29 }
  0x5a   : > { %1167 = vmatpush.msra.mxu3 %v446_v29  ;;  %405 = vmatpush.msra.mxu0 %v370_v30 }
  0x5b   : > { %1168 = vmatpush.msra.mxu1 %v445_v31  ;;  %1169 = vmatpush.msra.mxu2 %v445_v31 }
  0x5c   : > { %1170 = vmatpush.msra.mxu3 %v445_v31  ;;  %406 = vmatmul.f32.vlgmr.msra.gmra.mxu0 %v368_v32 }
  0x5d   : > { %492 = vmatmul.f32.vlgmr.msra.gmra.mxu1 %v418_v33  ;;  %461 = vmatpush.msrb.mxu0 %v1741_v1  ;;  %v444_v1 = vld [vmem:[%s1727_s10 + $0xf8] sm:$0xff] }
  0x5e   : > { %519 = vmatmul.f32.vlgmr.msra.gmra.mxu2 %v427_v34  ;;  %546 = vmatmul.f32.vlgmr.msra.gmra.mxu3 %v436_v35 }
  0x5f   : > { %462 = vmatpush.msrb.mxu0 %v1744_v3 }
  0x61   : > { %463 = vmatpush.msrb.mxu0 %v1748_v5 }
  0x63   : > { %464 = vmatpush.msrb.mxu0 %v1753_v7 }
  0x64   : > { %409 = vmatmul.f32.gmra.mxu0 %v369_v36 }
  0x65   : > { %495 = vmatmul.f32.gmra.mxu1 %v419_v37  ;;  %465 = vmatpush.msrb.mxu0 %v1758_v9 }
  0x66   : > { %522 = vmatmul.f32.gmra.mxu2 %v428_v38  ;;  %549 = vmatmul.f32.gmra.mxu3 %v437_v39 }
  0x67   : > { %466 = vmatpush.msrb.mxu0 %v1763_v11 }
  0x69   : > { %467 = vmatpush.msrb.mxu0 %v1768_v13 }
  0x6b   : > { %468 = vmatpush.msrb.mxu0 %v1773_v15 }
  0x6d   : > { %498 = vmatmul.f32.gmra.mxu1 %v420_v40  ;;  %469 = vmatpush.msrb.mxu0 %v1778_v17 }
  0x6e   : > { %525 = vmatmul.f32.gmra.mxu2 %v429_v41  ;;  %552 = vmatmul.f32.gmra.mxu3 %v438_v42 }
  0x6f   : > { %470 = vmatpush.msrb.mxu0 %v1783_v19 }
  0x71   : > { %471 = vmatpush.msrb.mxu0 %v1788_v21  ;;  %v1870_v21 = vld [vmem:[%s2056_s5] ss:$0 sm:$0xff] }
  0x73   : > { %472 = vmatpush.msrb.mxu0 %v1793_v23 }
  0x75   : > { %501 = vmatmul.f32.gmra.mxu1 %v421_v43  ;;  %473 = vmatpush.msrb.mxu0 %v1798_v25 }
  0x76   : > { %528 = vmatmul.f32.gmra.mxu2 %v430_v44  ;;  %555 = vmatmul.f32.gmra.mxu3 %v439_v45 }
  0x77   : > { %474 = vmatpush.msrb.mxu0 %v447_v27 }
  0x79   : > { %475 = vmatpush.msrb.mxu0 %v446_v29 }
  0x7b   : > { %476 = vmatpush.msrb.mxu0 %v445_v31 }
  0x7c   : > { %477 = vmatmul.f32.vlgmr.msrb.gmra.mxu0 %v413_v46 }
  0x7d   : > { %504 = vmatmul.f32.gmra.mxu1 %v422_v47 }
  0x7e   : > { %531 = vmatmul.f32.gmra.mxu2 %v431_v48  ;;  %558 = vmatmul.f32.gmra.mxu3 %v440_v49 }
  0x84   : > { %480 = vmatmul.f32.gmra.mxu0 %v414_v50 }
  0x85   : > { %507 = vmatmul.f32.gmra.mxu1 %v423_v51 }
  0x86   : > { %534 = vmatmul.f32.gmra.mxu2 %v432_v52  ;;  %561 = vmatmul.f32.gmra.mxu3 %v441_v53 }
  0x8c   : > { %483 = vmatmul.f32.gmra.mxu0 %v415_v54 }
  0x8d   : > { %510 = vmatmul.f32.gmra.mxu1 %v424_v55 }
  0x8e   : > { %537 = vmatmul.f32.gmra.mxu2 %v433_v56  ;;  %564 = vmatmul.f32.gmra.mxu3 %v442_v57 }
  0x94   : > { %486 = vmatmul.f32.gmra.mxu0 %v416_v58 }
  0x95   : > { %513 = vmatmul.f32.gmra.mxu1 %v425_v59 }
  0x96   : > { %540 = vmatmul.f32.gmra.mxu2 %v434_v60  ;;  %567 = vmatmul.f32.gmra.mxu3 %v443_v61 }
  0x9c   : > { %489 = vmatmul.f32.gmra.mxu0 %v417_v62 }
  0x9d   : > { %516 = vmatmul.f32.gmra.mxu1 %v426_v63 }
  0x9e   : > { %543 = vmatmul.f32.gmra.mxu2 %v435_v0  ;;  %570 = vmatmul.f32.gmra.mxu3 %v444_v1 }
  0xd9   : > { %v407_v3 = vpop.f32.mrf.mxu0 }
  0xda   : > { %v493_v4 = vpop.f32.mrf.mxu1  ;;  %v1856_v5 = vadd.f32 %v1264_v2, %v407_v3 }
  0xdc   : > { %v577_v6 = vrot.slane %v1856_v5, 2  ;;  %v582_v7 = vrot.slane %v1856_v5, 7  ;;  %v578_v8 = vrot.slane %v1856_v5, 3  ;;  %v579_v39 = vrot.slane %v1856_v5, 4 }
  0xdd   : > { %v590_v58 = vperm.slane %v1856_v5, 0 }
  0xde   : > { %v1861_v9 = vperm.slane %v577_v6, 0  ;;  %v597_v10 = vperm.slane %v582_v7, 0  ;;  %v593_v11 = vperm.slane %v578_v8, 0  ;;  %v594_v46 = vperm.slane %v579_v39, 0 }
  0xe0   : > { %v627_v12 = vadd.f32 %v1861_v9, %v493_v4 }
  0xe1   : > { %v520_v13 = vpop.f32.mrf.mxu2  ;;  %v547_v15 = vpop.f32.mrf.mxu3 }
  0xe2   : > { %v636_v14 = vadd.f32 %v597_v10, %v520_v13  ;;  %v410_v16 = vpop.f32.mrf.mxu0  ;;  %1266 = vtanh.f32 %v627_v12  ;;  %v496_v18 = vpop.f32.mrf.mxu1 }
  0xe3   : > { %v1864_v17 = vadd.f32 %v1264_v2, %v410_v16  ;;  %v628_v19 = vadd.f32 %v593_v11, %v496_v18 }
  0xe4   : > { %1268 = vtanh.f32 %v636_v14  ;;  %v576_v14 = vrot.slane %v1856_v5, 1 }
  0xe5   : > { %v585_v20 = vrot.slane %v1864_v17, 3  ;;  %1270 = vtanh.f32 %v628_v19  ;;  %v586_v33 = vrot.slane %v1864_v17, 4  ;;  %v598_v35 = vperm.slane %v1864_v17, 0 }
  0xe6   : > { %v587_v54 = vrot.slane %v1864_v17, 5  ;;  %v583_v18 = vrot.slane %v1864_v17, 1 }
  0xe7   : > { %v1872_v24 = vperm.slane %v585_v20, 0  ;;  %v602_v37 = vperm.slane %v586_v33, 0 }
  0xe8   : > { %v1267_v22 = vpop.eup %1266  ;;  %v603_v63 = vperm.slane %v587_v54, 0 }
  0xe9   : > { %v523_v23 = vpop.f32.mrf.mxu2  ;;  %v550_v27 = vpop.f32.mrf.mxu3  ;;  %v695_v28 = vmul.f32 %v1267_v22, %v1870_v21  ;;  %v645_v34 = vadd.f32 %v1872_v24, %v547_v15  ;;  %v580_v22 = vrot.slane %v1856_v5, 5 }
  0xea   : > { %v1269_v25 = vpop.eup %1268  ;;  %v1874_v26 = vadd.f32 %v597_v10, %v523_v23  ;;  %v499_v29 = vpop.f32.mrf.mxu1  ;;  %v646_v45 = vadd.f32 %v602_v37, %v550_v27  ;;  %v591_v23 = vperm.slane %v576_v14, 0 }
  0xeb   : > { %v704_v30 = vmul.f32 %v1269_v25, %v1870_v21  ;;  %v629_v31 = vadd.f32 %v593_v11, %v499_v29  ;;  %732 = vadd.xlane.f32.xlu0 %v695_v28  ;;  %v1271_v32 = vpop.eup %1270  ;;  %v599_v29 = vperm.slane %v583_v18, 0  ;;  %v589_v18 = vrot.slane %v1864_v17, 7 }
  0xec   : > { %v696_v36 = vmul.f32 %v1271_v32, %v1870_v21  ;;  %v595_v32 = vperm.slane %v580_v22, 0 }
  0xed   : > { %750 = vadd.xlane.f32.xlu1 %v704_v30  ;;  %1272 = vtanh.f32 %v629_v31 }
  0xee   : > { %1274 = vtanh.f32 %v645_v34 }
  0xf1   : > { %v526_v38 = vpop.f32.mrf.mxu2  ;;  %v553_v41 = vpop.f32.mrf.mxu3 }
  0xf2   : > { %v638_v40 = vadd.f32 %v598_v35, %v526_v38  ;;  %v647_v42 = vadd.f32 %v602_v37, %v553_v41  ;;  %v502_v43 = vpop.f32.mrf.mxu1 }
  0xf3   : > { %v1273_v44 = vpop.eup %1272  ;;  %734 = vadd.xlane.f32.xlu0 %v696_v36  ;;  %v630_v49 = vadd.f32 %v594_v46, %v502_v43 }
  0xf4   : > { %1276 = vtanh.f32 %v638_v40  ;;  %v697_v47 = vmul.f32 %v1273_v44, %v1870_v21  ;;  %v1275_v48 = vpop.eup %1274  ;;  %v588_v40 = vrot.slane %v1864_v17, 6 }
  0xf5   : > { %1278 = vtanh.f32 %v647_v42  ;;  %v713_v56 = vmul.f32 %v1275_v48, %v1870_v21 }
  0xf6   : > { %736 = vadd.xlane.f32.xlu1 %v697_v47  ;;  %1280 = vtanh.f32 %v646_v45  ;;  %v604_v47 = vperm.slane %v588_v40, 0 }
  0xf7   : > { %1282 = vtanh.f32 %v630_v49 }
  0xf9   : > { %v529_v50 = vpop.f32.mrf.mxu2  ;;  %v556_v53 = vpop.f32.mrf.mxu3 }
  0xfa   : > { %v1277_v51 = vpop.eup %1276  ;;  %v639_v52 = vadd.f32 %v598_v35, %v529_v50  ;;  %v478_v55 = vpop.f32.mrf.mxu0  ;;  %v648_v2 = vadd.f32 %v603_v63, %v556_v53 }
  0xfb   : > { %v1279_v57 = vpop.eup %1278  ;;  %v505_v59 = vpop.f32.mrf.mxu1  ;;  %v706_v60 = vmul.f32 %v1277_v51, %v1870_v21  ;;  %768 = vadd.xlane.f32.xlu0 %v713_v56  ;;  %v622_v62 = vadd.f32 %v590_v58, %v478_v55  ;;  %v584_v56 = vrot.slane %v1864_v17, 2 }
  0xfc   : > { %1284 = vtanh.f32 %v639_v52  ;;  %v715_v61 = vmul.f32 %v1279_v57, %v1870_v21  ;;  %v631_v0 = vadd.f32 %v594_v46, %v505_v59  ;;  %v1281_v1 = vpop.eup %1280 }
  0xfd   : > { %754 = vadd.xlane.f32.xlu2 %v706_v60  ;;  %v1283_v3 = vpop.eup %1282  ;;  %1286 = vtanh.f32 %v622_v62  ;;  %v714_v7 = vmul.f32 %v1281_v1, %v1870_v21 }
  0xfe   : > { %772 = vadd.xlane.f32.xlu1 %v715_v61  ;;  %1288 = vtanh.f32 %v631_v0  ;;  %v698_v13 = vmul.f32 %v1283_v3, %v1870_v21  ;;  %v600_v0 = vperm.slane %v584_v56, 0  ;;  %v581_v3 = vrot.slane %v1856_v5, 6 }
  0xff   : > { %1290 = vtanh.f32 %v648_v2 }
 0x101   : > { %v532_v8 = vpop.f32.mrf.mxu2  ;;  %v559_v10 = vpop.f32.mrf.mxu3 }
 0x102   : > { %v1285_v4 = vpop.eup %1284  ;;  %v481_v6 = vpop.f32.mrf.mxu0  ;;  %v649_v15 = vadd.f32 %v603_v63, %v559_v10  ;;  %v640_v33 = vadd.f32 %v599_v29, %v532_v8 }
 0x103   : > { %v707_v11 = vmul.f32 %v1285_v4, %v1870_v21  ;;  %770 = vadd.xlane.f32.xlu0 %v714_v7  ;;  %v623_v12 = vadd.f32 %v590_v58, %v481_v6  ;;  %v1287_v16 = vpop.eup %1286  ;;  %v508_v19 = vpop.f32.mrf.mxu1 }
 0x104   : > { %v1289_v20 = vpop.eup %1288  ;;  %v690_v28 = vmul.f32 %v1287_v16, %v1870_v21  ;;  %v632_v36 = vadd.f32 %v595_v32, %v508_v19 }
 0x105   : > { %756 = vadd.xlane.f32.xlu2 %v707_v11  ;;  %1292 = vtanh.f32 %v623_v12  ;;  %v1291_v25 = vpop.eup %1290  ;;  %v699_v31 = vmul.f32 %v1289_v20, %v1870_v21  ;;  %v596_v11 = vperm.slane %v581_v3, 0 }
 0x106   : > { %738 = vadd.xlane.f32.xlu1 %v698_v13  ;;  %1294 = vtanh.f32 %v649_v15  ;;  %v716_v35 = vmul.f32 %v1291_v25, %v1870_v21  ;;  %v605_v25 = vperm.slane %v589_v18, 0 }
 0x109   : > { %v535_v34 = vpop.f32.mrf.mxu2  ;;  %v562_v38 = vpop.f32.mrf.mxu3 }
 0x10a   : > { %v484_v27 = vpop.f32.mrf.mxu0  ;;  %v650_v50 = vadd.f32 %v604_v47, %v562_v38  ;;  %v641_v54 = vadd.f32 %v599_v29, %v535_v34 }
 0x10b   : > { %v624_v30 = vadd.f32 %v591_v23, %v484_v27  ;;  %722 = vadd.xlane.f32.xlu0 %v690_v28  ;;  %v1293_v37 = vpop.eup %1292  ;;  %v511_v41 = vpop.f32.mrf.mxu1 }
 0x10c   : > { %v1295_v39 = vpop.eup %1294  ;;  %v691_v43 = vmul.f32 %v1293_v37, %v1870_v21  ;;  %v633_v48 = vadd.f32 %v595_v32, %v511_v41 }
 0x10d   : > { %740 = vadd.xlane.f32.xlu2 %v699_v31  ;;  %1296 = vtanh.f32 %v624_v30  ;;  %v717_v45 = vmul.f32 %v1295_v39, %v1870_v21 }
 0x10e   : > { %774 = vadd.xlane.f32.xlu1 %v716_v35  ;;  %1298 = vtanh.f32 %v640_v33 }
 0x10f   : > { %1300 = vtanh.f32 %v632_v36 }
 0x111   : > { %v538_v52 = vpop.f32.mrf.mxu2  ;;  %v565_v55 = vpop.f32.mrf.mxu3 }
 0x112   : > { %v487_v42 = vpop.f32.mrf.mxu0  ;;  %v651_v62 = vadd.f32 %v604_v47, %v565_v55  ;;  %v642_v6 = vadd.f32 %v600_v0, %v538_v52  ;;  %v787_v47 = vlaneseq }
 0x113   : > { %v625_v44 = vadd.f32 %v591_v23, %v487_v42  ;;  %v1297_v46 = vpop.eup %1296  ;;  %724 = vadd.xlane.f32.xlu0 %v691_v43  ;;  %v514_v58 = vpop.f32.mrf.mxu1 }
 0x114   : > { %v692_v49 = vmul.f32 %v1297_v46, %v1870_v21  ;;  %v1299_v51 = vpop.eup %1298  ;;  %v634_v14 = vadd.f32 %v596_v11, %v514_v58 }
 0x115   : > { %776 = vadd.xlane.f32.xlu2 %v717_v45  ;;  %1302 = vtanh.f32 %v625_v44  ;;  %v1301_v53 = vpop.eup %1300  ;;  %v708_v57 = vmul.f32 %v1299_v51, %v1870_v21 }
 0x116   : > { %726 = vadd.xlane.f32.xlu1 %v692_v49  ;;  %1304 = vtanh.f32 %v633_v48  ;;  %v700_v60 = vmul.f32 %v1301_v53, %v1870_v21  ;;  %v1926_v49 = vand.u32 127, %v787_v47 }
 0x117   : > { %1306 = vtanh.f32 %v650_v50 }
 0x118   : > { %1308 = vtanh.f32 %v641_v54  ;;  %v1929_v50 = vadd.s32 4294967288, %v1926_v49  ;;  %vm791_vm9 = vcmp.lt.s32.totalorder %v1926_v49, 10 }
 0x119   : > { %1310 = vtanh.f32 %v651_v62  ;;  %v541_v7 = vpop.f32.mrf.mxu2  ;;  %v568_v12 = vpop.f32.mrf.mxu3 }
 0x11a   : > { %v490_v59 = vpop.f32.mrf.mxu0  ;;  %v643_v15 = vadd.f32 %v600_v0, %v541_v7  ;;  %v652_v29 = vadd.f32 %v605_v25, %v568_v12 }
 0x11b   : > { %v1303_v61 = vpop.eup %1302  ;;  %758 = vadd.xlane.f32.xlu0 %v708_v57  ;;  %v626_v1 = vadd.f32 %v1861_v9, %v490_v59  ;;  %v517_v9 = vpop.f32.mrf.mxu1 }
 0x11c   : > { %v693_v63 = vmul.f32 %v1303_v61, %v1870_v21  ;;  %v1305_v2 = vpop.eup %1304  ;;  %v635_v20 = vadd.f32 %v596_v11, %v517_v9 }
 0x11d   : > { %742 = vadd.xlane.f32.xlu2 %v700_v60  ;;  %v1307_v4 = vpop.eup %1306  ;;  %1312 = vtanh.f32 %v626_v1  ;;  %v701_v10 = vmul.f32 %v1305_v2, %v1870_v21 }
 0x11e   : > { %728 = vadd.xlane.f32.xlu1 %v693_v63  ;;  %v1309_v8 = vpop.eup %1308  ;;  %v718_v13 = vmul.f32 %v1307_v4, %v1870_v21  ;;  %1314 = vtanh.f32 %v642_v6 }
 0x11f   : > { %v709_v5 = vmul.f32 %v1309_v8, %v1870_v21  ;;  %v1311_v16 = vpop.eup %1310  ;;  %1316 = vtanh.f32 %v634_v14  ;;  %v1558_v8 = vmov -1e+30  }
 0x120   : > { %1318 = vtanh.f32 %v643_v15  ;;  %v719_v23 = vmul.f32 %v1311_v16, %v1870_v21  ;;  %901 = vst.msk [vmem:[#allocation2 + $0x8] sm:$0xff] %vm899_vm1, %v1558_v8 }
 0x121   : > { %v544_v27 = vpop.f32.mrf.mxu2  ;;  %1320 = vtanh.f32 %v635_v20  ;;  %v571_v30 = vpop.f32.mrf.mxu3  ;;  %900 = vst.msk [vmem:[#allocation2] sm:$0xff] %vm899_vm1, %v1558_v8 }
 0x122   : > { %v644_v17 = vadd.f32 %v1872_v24, %v544_v27  ;;  %v653_v34 = vadd.f32 %v605_v25, %v571_v30  ;;  %1322 = vtanh.f32 %v652_v29 }
 0x123   : > { %744 = vadd.xlane.f32.xlu0 %v701_v10  ;;  %v1313_v19 = vpop.eup %1312 }
 0x124   : > { %v1315_v22 = vpop.eup %1314  ;;  %v694_v28 = vmul.f32 %v1313_v19, %v1870_v21  ;;  %1324 = vtanh.f32 %v644_v17 }
 0x125   : > { %778 = vadd.xlane.f32.xlu2 %v718_v13  ;;  %v710_v31 = vmul.f32 %v1315_v22, %v1870_v21  ;;  %v1317_v32 = vpop.eup %1316  ;;  %1326 = vtanh.f32 %v653_v34 }
 0x126   : > { %760 = vadd.xlane.f32.xlu1 %v709_v5  ;;  %v1319_v33 = vpop.eup %1318  ;;  %v702_v36 = vmul.f32 %v1317_v32, %v1870_v21  ;;  %1328 = vtanh.f32 %v1874_v26 }
 0x127   : > { %v1321_v35 = vpop.eup %1320  ;;  %v711_v37 = vmul.f32 %v1319_v33, %v1870_v21 }
 0x128   : > { %v703_v38 = vmul.f32 %v1321_v35, %v1870_v21  ;;  %v1323_v39 = vpop.eup %1322 }
 0x129   : > { %v720_v41 = vmul.f32 %v1323_v39, %v1870_v21 }
 0x12a   : > { %v1325_v40 = vpop.eup %1324 }
 0x12b   : > { %780 = vadd.xlane.f32.xlu0 %v719_v23  ;;  %v1327_v24 = vpop.eup %1326  ;;  %v712_v42 = vmul.f32 %v1325_v40, %v1870_v21 }
 0x12c   : > { %v721_v43 = vmul.f32 %v1327_v24, %v1870_v21  ;;  %v1329_v44 = vpop.eup %1328 }
 0x12d   : > { %730 = vadd.xlane.f32.xlu2 %v694_v28  ;;  %v705_v45 = vmul.f32 %v1329_v44, %v1870_v21 }
 0x12e   : > { %762 = vadd.xlane.f32.xlu1 %v710_v31 }
 0x133   : > { %746 = vadd.xlane.f32.xlu0 %v702_v36 }
 0x135   : > { %764 = vadd.xlane.f32.xlu2 %v711_v37 }
 0x136   : > { %748 = vadd.xlane.f32.xlu1 %v703_v38 }
 0x13b   : > { %782 = vadd.xlane.f32.xlu0 %v720_v41 }
 0x13d   : > { %766 = vadd.xlane.f32.xlu2 %v712_v42 }
 0x13e   : > { %784 = vadd.xlane.f32.xlu1 %v721_v43 }
 0x145   : > { %752 = vadd.xlane.f32.xlu2 %v705_v45 }
 0x15e   : > { %v733_v46 = vpop.xlane.xlu0 %732 }
 0x15f   : > { %v833_v16 = vperm.slane %v733_v46, %v1929_v50 }
 0x160   : > { %v1924_v48 = vpop.xlane.xlu1 %750 }
 0x166   : > { %v735_v26 = vpop.xlane.xlu0 %734 }
 0x167   : > { %v835_v52 = vperm.slane %v735_v26, %v1926_v49 }
 0x169   : > { %v737_v51 = vpop.xlane.xlu1 %736 }
 0x16a   : > { %v836_v53 = vperm.slane %v737_v51, %v1929_v50 }
 0x16c   : > { %v837_v54 = vsel %vm827_vm0, %v836_v53, %v835_v52 }
 0x16e   : > { %v1934_v21 = vpop.xlane.xlu0 %768 }
 0x16f   : > { %v860_v41 = vperm.slane %v1934_v21, %v1929_v50 }
 0x170   : > { %v755_v55 = vpop.xlane.xlu2 %754 }
 0x171   : > { %v773_v56 = vpop.xlane.xlu1 %772  ;;  %v850_v39 = vperm.slane %v755_v55, %v1926_v49 }
 0x172   : > { %v863_v36 = vperm.slane %v773_v56, %v1929_v50 }
 0x176   : > { %v771_v57 = vpop.xlane.xlu0 %770 }
 0x177   : > { %v862_v17 = vperm.slane %v771_v57, %v1926_v49 }
 0x178   : > { %v757_v58 = vpop.xlane.xlu2 %756 }
 0x179   : > { %v739_v59 = vpop.xlane.xlu1 %738  ;;  %v851_v33 = vperm.slane %v757_v58, %v1929_v50  ;;  %v864_v42 = vsel %vm827_vm0, %v863_v36, %v862_v17 }
 0x17a   : > { %v838_v40 = vperm.slane %v739_v59, %v1926_v49 }
 0x17b   : > { %v852_v46 = vsel %vm827_vm0, %v851_v33, %v850_v39 }
 0x17e   : > { %v723_v60 = vpop.xlane.xlu0 %722 }
 0x17f   : > { %v824_v9 = vperm.slane %v723_v60, %v1926_v49 }
 0x180   : > { %v741_v61 = vpop.xlane.xlu2 %740 }
 0x181   : > { %v775_v62 = vpop.xlane.xlu1 %774  ;;  %v839_v34 = vperm.slane %v741_v61, %v1929_v50 }
 0x182   : > { %v865_v43 = vperm.slane %v775_v62, %v1926_v49 }
 0x183   : > { %v840_v47 = vsel %vm827_vm0, %v839_v34, %v838_v40 }
 0x186   : > { %v725_v63 = vpop.xlane.xlu0 %724 }
 0x187   : > { %v826_v12 = vperm.slane %v725_v63, %v1929_v50 }
 0x188   : > { %v777_v0 = vpop.xlane.xlu2 %776 }
 0x189   : > { %v727_v1 = vpop.xlane.xlu1 %726  ;;  %v828_v19 = vsel %vm827_vm0, %v826_v12, %v824_v9  ;;  %v866_v37 = vperm.slane %v777_v0, %v1929_v50  ;;  %v847_v12 = vperm.slane %v1924_v48, %v1926_v49 }
 0x18a   : > { %v829_v13 = vperm.slane %v727_v1, %v1926_v49 }
 0x18b   : > { %v867_v51 = vsel %vm827_vm0, %v866_v37, %v865_v43 }
 0x18e   : > { %v759_v2 = vpop.xlane.xlu0 %758 }
 0x18f   : > { %v853_v35 = vperm.slane %v759_v2, %v1926_v49 }
 0x190   : > { %v1936_v3 = vpop.xlane.xlu2 %742 }
 0x191   : > { %v729_v4 = vpop.xlane.xlu1 %728  ;;  %v841_v58 = vperm.slane %v1936_v3, %v1926_v49 }
 0x192   : > { %v830_v11 = vperm.slane %v729_v4, %v1929_v50 }
 0x194   : > { %v831_v5 = vsel %vm827_vm0, %v830_v11, %v829_v13 }
 0x195   : > { %v875_v22 = vsel %vm874_vm2, %v831_v5, %v828_v19 }
 0x196   : > { %v1938_v6 = vpop.xlane.xlu0 %744 }
 0x197   : > { %v842_v62 = vperm.slane %v1938_v6, %v1929_v50 }
 0x198   : > { %v1940_v7 = vpop.xlane.xlu2 %778 }
 0x199   : > { %v761_v10 = vpop.xlane.xlu1 %760  ;;  %v868_v59 = vperm.slane %v1940_v7, %v1926_v49  ;;  %v843_v13 = vsel %vm827_vm0, %v842_v62, %v841_v58 }
 0x19a   : > { %v854_v31 = vperm.slane %v761_v10, %v1929_v50 }
 0x19c   : > { %v855_v24 = vsel %vm827_vm0, %v854_v31, %v853_v35 }
 0x19d   : > { %v888_v52 = vsel %vm874_vm2, %v855_v24, %v852_v46 }
 0x19e   : > { %v781_v14 = vpop.xlane.xlu0 %780 }
 0x19f   : > { %v869_v53 = vperm.slane %v781_v14, %v1929_v50 }
 0x1a0   : > { %v731_v15 = vpop.xlane.xlu2 %730 }
 0x1a1   : > { %v832_v18 = vperm.slane %v731_v15, %v1926_v49  ;;  %v763_v20 = vpop.xlane.xlu1 %762  ;;  %v870_v1 = vsel %vm827_vm0, %v869_v53, %v868_v59 }
 0x1a2   : > { %v856_v38 = vperm.slane %v763_v20, %v1926_v49 }
 0x1a3   : > { %v834_v23 = vsel %vm827_vm0, %v833_v16, %v832_v18 }
 0x1a4   : > { %v877_v25 = vsel %vm876_vm3, %v834_v23, %v875_v22 }
 0x1a5   : > { %v879_v27 = vsel %vm878_vm4, %v837_v54, %v877_v25 }
 0x1a6   : > { %v747_v28 = vpop.xlane.xlu0 %746  ;;  %v881_v4 = vsel %vm880_vm5, %v840_v47, %v879_v27 }
 0x1a7   : > { %v844_v2 = vperm.slane %v747_v28, %v1926_v49  ;;  %v883_v5 = vsel %vm882_vm6, %v843_v13, %v881_v4 }
 0x1a8   : > { %v765_v29 = vpop.xlane.xlu2 %764 }
 0x1a9   : > { %v749_v30 = vpop.xlane.xlu1 %748  ;;  %v857_v32 = vperm.slane %v765_v29, %v1929_v50 }
 0x1aa   : > { %v845_v60 = vperm.slane %v749_v30, %v1929_v50 }
 0x1ab   : > { %v858_v44 = vsel %vm827_vm0, %v857_v32, %v856_v38 }
 0x1ac   : > { %v889_v55 = vsel %vm876_vm3, %v858_v44, %v888_v52  ;;  %v846_v8 = vsel %vm827_vm0, %v845_v60, %v844_v2 }
 0x1ad   : > { %v885_v15 = vsel %vm884_vm7, %v846_v8, %v883_v5 }
 0x1ae   : > { %v783_v54 = vpop.xlane.xlu0 %782 }
 0x1af   : > { %v871_v63 = vperm.slane %v783_v54, %v1926_v49 }
 0x1b0   : > { %v767_v45 = vpop.xlane.xlu2 %766 }
 0x1b1   : > { %v859_v26 = vperm.slane %v767_v45, %v1926_v49  ;;  %v785_v21 = vpop.xlane.xlu1 %784 }
 0x1b2   : > { %v872_v57 = vperm.slane %v785_v21, %v1929_v50 }
 0x1b3   : > { %v861_v56 = vsel %vm827_vm0, %v860_v41, %v859_v26 }
 0x1b4   : > { %v890_v61 = vsel %vm878_vm4, %v861_v56, %v889_v55  ;;  %v873_v6 = vsel %vm827_vm0, %v872_v57, %v871_v63 }
 0x1b5   : > { %v891_v0 = vsel %vm880_vm5, %v864_v42, %v890_v61 }
 0x1b6   : > { %v892_v3 = vsel %vm882_vm6, %v867_v51, %v891_v0 }
 0x1b7   : > { %v893_v7 = vsel %vm884_vm7, %v870_v1, %v892_v3 }
 0x1b8   : > { %v894_v10 = vsel %vm886_vm8, %v873_v6, %v893_v7  ;;  %v753_v11 = vpop.xlane.xlu2 %752 }
 0x1b9   : > { %v898_v14 = vsel %vm791_vm9, %v894_v10, -1e+30  ;;  %v848_v9 = vperm.slane %v753_v11, %v1929_v50 }
 0x1ba   : > { %904 = vst.msk [vmem:[#allocation2 + $0x8] sm:$0xff] %vm902_vm10, %v898_v14 }
 0x1bb   : > { %v849_v16 = vsel %vm827_vm0, %v848_v9, %v847_v12 }
 0x1bc   : > { %v887_v18 = vsel %vm886_vm8, %v849_v16, %v885_v15 }
 0x1bd   : > { %v897_v19 = vsel %vm791_vm9, %v887_v18, -1e+30 }
 0x1be   : > { %903 = vst.msk [vmem:[#allocation2] sm:$0xff] %vm902_vm10, %v897_v19 }
 0x1c1   : > { %v906_v48 = vld [vmem:[#allocation2 + $0x8] sm:$0xff] }
 0x1c2   : > { %909 = vmax.xlane.f32.xlu0 %v906_v48 }
 0x1c5   : > { %v905_v20 = vld [vmem:[#allocation2] sm:$0xff] }
 0x1c6   : > { %907 = vmax.xlane.f32.xlu2 %v905_v20 }
 0x235   : > { %v910_v22 = vpop.xlane.xlu0 %909 }
 0x236   : > { %v912_v23 = vsub.f32 %v906_v48, %v910_v22 }
 0x238   : > { %v915_v50 = vmul.f32 1.442695, %v912_v23 }
 0x239   : > { %v908_v25 = vpop.xlane.xlu2 %907 }
 0x23a   : > { %1330 = vpow2.f32 %v915_v50  ;;  %v911_v27 = vsub.f32 %v905_v20, %v908_v25 }
 0x23c   : > { %v913_v28 = vmul.f32 1.442695, %v911_v27 }
 0x23e   : > { %1332 = vpow2.f32 %v913_v28 }
 0x240   : > { %v1331_v29 = vpop.eup %1330 }
 0x241   : > { %919 = vadd.xlane.f32.xlu2 %v1331_v29 }
 0x244   : > { %v1333_v30 = vpop.eup %1332 }
 0x245   : > { %917 = vadd.xlane.f32.xlu1 %v1333_v30 }
 0x2b4   : > { %v920_v49 = vpop.xlane.xlu2 %919 }
 0x2b5   : > { %1334 = vrcp.f32 %v920_v49  ;;  %v945_v35 = vand.u32 2147483647, %v920_v49  ;;  %v947_v36 = vand.u32 2147483648, %v920_v49  ;;  %vm941_vm12 = vweird.f32 %v920_v49 }
 0x2b7   : > { %vm946_vm14 = vcmp.eq.f32.partialorder %v945_v35, 8.507059e+37  ;;  %v948_v24 = vor.u32 1.1754944e-38, %v947_v36 }
 0x2b8   : > { %v918_v31 = vpop.xlane.xlu1 %917 }
 0x2b9   : > { %1336 = vrcp.f32 %v918_v31  ;;  %v932_v41 = vand.u32 2147483648, %v918_v31  ;;  %v930_v44 = vand.u32 2147483647, %v918_v31  ;;  %vm926_vm0 = vweird.f32 %v918_v31 }
 0x2bb   : > { %v1335_v17 = vpop.eup %1334  ;;  %v933_v26 = vor.u32 1.1754944e-38, %v932_v41  ;;  %vm931_vm2 = vcmp.eq.f32.partialorder %v930_v44, 8.507059e+37 }
 0x2bc   : > { %v937_v32 = vmul.f32 %v1335_v17, %v920_v49  ;;  %vm942_vm11 = vweird.f32 %v1335_v17 }
 0x2bd   : > { %vm943_vm13 = vmor %vm941_vm12, %vm942_vm11 }
 0x2be   : > { %v938_v33 = vsub.f32 1.0, %v937_v32 }
 0x2bf   : > { %v1337_v34 = vpop.eup %1336 }
 0x2c0   : > { %v939_v37 = vmul.f32 %v1335_v17, %v938_v33  ;;  %v922_v38 = vmul.f32 %v1337_v34, %v918_v31  ;;  %vm927_vm15 = vweird.f32 %v1337_v34 }
 0x2c1   : > { %vm928_vm1 = vmor %vm926_vm0, %vm927_vm15 }
 0x2c2   : > { %v940_v39 = vadd.f32 %v1335_v17, %v939_v37  ;;  %v923_v40 = vsub.f32 1.0, %v922_v38 }
 0x2c4   : > { %v944_v42 = vsel %vm943_vm13, %v1335_v17, %v940_v39  ;;  %v924_v43 = vmul.f32 %v1337_v34, %v923_v40 }
 0x2c5   : > { %v949_v45 = vsel %vm946_vm14, %v948_v24, %v944_v42 }
 0x2c6   : > { %v950_v46 = vmul.f32 %v1331_v29, %v949_v45  ;;  %v925_v47 = vadd.f32 %v1337_v34, %v924_v43 }
 0x2c8   : > { %952 = vst [vmem:[%s363_s24 + $0x8] sm:$0xff] %v950_v46  ;;  %v929_v51 = vsel %vm928_vm1, %v1337_v34, %v925_v47 }
 0x2c9   : > { %v934_v52 = vsel %vm931_vm2, %v933_v26, %v929_v51 }
 0x2ca   : > { %v935_v53 = vmul.f32 %v1333_v30, %v934_v52 }
 0x2cc   : > { %951 = vst [vmem:[%s363_s24] sm:$0xff] %v935_v53 }
 0x2cd   : > { %1485 = shalt.err (!%p1482_p0)
}
 0x2ce   : > { %s1559_s2 = smov 128   ;;  %s1560_s23 = smov 8  }
 0x2cf   : > { %1183 = dma.vmem_to_hbm [thread:$0]  (%p1681_p7), %s967_s15, 256, %s969_s13, %s954_s12, %s1559_s2, %s1559_s2, %s1560_s23  }
 0x2d0 PF: > { %s2082_s10 = sld [smem:[#allocation17_spill]]  ;;  %p1200_p3 = pnand %p1100_p11, %p1641_p6 }
 0x2d2   : > { %p1201_p5 = pneg %p1200_p3 }
 0x2d6   : > { %s983_s29 = sand.u32 1, %s2082_s10  }
 0x2d7   : > { %s984_s11 = scalar_lea.sflag [#allocation5], %s983_s29 }
 0x2d8   : > { %1527 = dma.done.wait (%p1201_p5), %s984_s11, 256  }
 0x2d9   : > { %1529 = vsyncadd (%p1201_p5), %s984_s11, 4294967040  ;;  %s26_s26 = sadd.s32 1, %s1552_s26   ;;  %s2084_s14 = sld [smem:[#allocation18_spill]] }
 0x2da   : > { %p23_p9 = scmp.ge.s32.totalorder %s26_s26, 4   ;;  %s2085_s23 = sld [smem:[#allocation21_spill]] }
 0x2db   : > { %s2086_s8 = sld [smem:[#allocation20_spill]]  ;;  %s2087_s21 = smov %s1536_s22 }
 0x2dc   : > { %s2089_s24 = smov %s1548_s25 }
 0x2dd   :  { %25 = sbr.rel (!%p23_p9) target bundleno = 12 (0xc), region = 110 }
 0x2df   : > { %s2088_s22 = smov %s2084_s14 }
 0x2e1   : > { %s2090_s25 = smov %s2086_s8 }
 0x2e2   :  { %990 = vsyncpa [#allocation4], 1 }
 0x2e3   :  { %992 = vsyncpa [#allocation4 + $0x1], 1 }
 0x2e4   :  { %993 = vsyncpa [#allocation7], 1 }
 0x2e5   :  { %995 = vsyncpa [#allocation7 + $0x1], 1 }
 0x2e6   :  { %996 = vsyncpa [#allocation10], 1 }
 0x2e7   :  { %997 = vsyncpa [#allocation5], 1 }
 0x2e8   :  { %999 = vsyncpa [#allocation5 + $0x1], 1 }

// kernel: tpu_custom_call.1
= control target key start
LH: loop header
LB: loop body
LE: loop exit
PB: predicated region body
PF: predicated region fallthrough
CT: control target
= control target key end

     0   :  { %s2051_s0 = inlined_call_operand.hbm [shape: f32[32,128], index: 0, kind: input, shape index: {}]   ;;  %s2052_s1 = inlined_call_operand.hbm [shape: f32[32,16,128], index: 1, kind: input, shape index: {}]   ;;  %s2053_s2 = inlined_call_operand.hbm [shape: f32[128,128], index: 2, kind: input, shape index: {}]   ;;  %s2054_s3 = inlined_call_operand.hbm [shape: f32[128,128], index: 3, kind: input, shape index: {}]   ;;  %s2055_s4 = inlined_call_operand.vmem [shape: f32[1,128], index: 4, kind: input, shape index: {}]   ;;  %s2056_s5 = inlined_call_operand.vmem [shape: f32[1,128], index: 5, kind: input, shape index: {}]   ;;  %s2057_s6 = inlined_call_operand.hbm [shape: f32[32,128], index: 6, kind: output, shape index: {}]  }
   0x1   :  { %2066 = sst [smem:[#allocation22_spill]] %s2053_s2 }
   0x2   :  { %2067 = sst [smem:[#allocation23_spill]] %s2054_s3 }
   0x3   :  { %11 = vsyncpa [#allocation4], 0 }
   0x4   :  { %13 = vsyncpa [#allocation4 + $0x1], 0 }
   0x5   :  { %14 = vsyncpa [#allocation7], 0 }
   0x6   :  { %16 = vsyncpa [#allocation7 + $0x1], 0 }
   0x7   :  { %17 = vsyncpa [#allocation10], 0 }
   0x8   :  { %18 = vsyncpa [#allocation5], 0 }
   0x9   :  { %20 = vsyncpa [#allocation5 + $0x1], 0  ;;  %s1596_s21 = smov 0   ;;  %s1598_s22 = smov 0  }
   0xa   :  { %s1600_s23 = smov 0   ;;  %s1602_s24 = smov 0  }
   0xb   :  { %s1604_s25 = smov 0   ;;  %s1606_s26 = smov 0  }
   0xc LB: > { %2068 = sst [smem:[#allocation17_spill]] %s1532_s21  ;;  %s1627_s27 = sadd.s32 4294967295, %s1552_s26   ;;  %s1552_s26 = sphi %s1606_s26, %s26_s26   ;;  %s1548_s25 = sphi %s1604_s25, %s2090_s25   ;;  %s1544_s24 = sphi %s1602_s24, %s2089_s24   ;;  %s1540_s23 = sphi %s1600_s23, %s2085_s23   ;;  %s1536_s22 = sphi %s1598_s22, %s2088_s22   ;;  %s1532_s21 = sphi %s1596_s21, %s2087_s21  }
   0xd   : > { %2069 = sst [smem:[#allocation18_spill]] %s1540_s23  ;;  %s1096_s28 = sadd.s32 4294967294, %s1552_s26  }
   0xe   : > { %p58_p0 = scmp.ne.s32.totalorder %s1536_s22, %s1532_s21  ;;  %p59_p1 = scmp.eq.s32.totalorder %s1627_s27, 0 }
   0xf   : > { %p194_p2 = scmp.eq.s32.totalorder %s1627_s27, 1  ;;  %p200_p3 = scmp.eq.s32.totalorder %s1096_s28, 1 }
  0x10   : > { %p1636_p4 = por %p59_p1, %p58_p0  ;;  %p1097_p5 = scmp.ge.s32.totalorder %s1552_s26, 1 }
  0x11   : > { %p1641_p6 = por %p200_p3, %p58_p0  ;;  %p207_p7 = scmp.lt.s32.totalorder %s1552_s26, 3 }
  0x12   : > { %s2073_s2 = sld [smem:[#allocation22_spill]]  ;;  %s1554_s11 = smov [#allocation8]  }
  0x13   : > { %s2071_s30 = scalar_select %p1641_p6, 1, 0 }
  0x14   : > { %p1649_p8 = pnand %p1097_p5, %p207_p7  ;;  %s220_s12 = sshll.u32 %s1554_s11, 4  ;;  %s221_s12 = int_to_ptr.vmem [resolvable:$true] %s220_s12 }
  0x15   : > { %2072 = sst [smem:[#allocation19_spill]] %s2071_s30  ;;  %p1100_p11 = scmp.ge.s32.totalorder %s1552_s26, 2 }
  0x16   : > { %p1185_p9 = pneg %p1649_p8  ;;  %s2075_s3 = sld [smem:[#allocation23_spill]] }
  0x17   : > { %s2058_s16 = smov 128   ;;  %s2060_s17 = smov 8  }
  0x18   : > { %s218_s9 = sshll.u32 %s2073_s2, 4  ;;  %p1186_p10 = pnand %p1185_p9, %p59_p1  ;;  %s219_s9 = int_to_ptr.hbm [resolvable:$true] %s218_s9 }
  0x19   : > { %s1557_s18 = smov [#allocation9]   ;;  %s38_s20 = sadd.s32 1, %s1548_s25 }
  0x1a   : > { %1188 = dma.hbm_to_vmem [thread:$0]  (!%p1186_p10), %s219_s9, 2048, %s221_s12, [#allocation7], %s2058_s16, %s2058_s16, %s2060_s17  }
  0x1b   : > { %s234_s19 = sshll.u32 %s1557_s18, 4  ;;  %s45_s28 = sadd.s32 1, %s1540_s23  ;;  %s235_s19 = int_to_ptr.vmem [resolvable:$true] %s234_s19 }
  0x1c   : > { %s232_s15 = sshll.u32 %s2075_s3, 4  ;;  %p40_p12 = scmp.ge.s32.totalorder %s38_s20, 2  ;;  %s233_s15 = int_to_ptr.hbm [resolvable:$true] %s232_s15 }
  0x1d   : > { %1191 = dma.hbm_to_vmem [thread:$0]  (!%p1186_p10), %s233_s15, 2048, %s235_s19, [#allocation10], %s2058_s16, %s2058_s16, %s2060_s17  }
  0x1e   : > { %p52_p13 = scmp.ne.s32.totalorder %s1540_s23, %s1536_s22  ;;  %p53_p0 = scmp.eq.s32.totalorder %s1552_s26, 0 }
  0x1f   : > { %p1205_p3 = scmp.lt.s32.totalorder %s1552_s26, 2  ;;  %s2092_s20 = smov (%p40_p12, %s38_s20), 0 }
  0x20   : > { %2076 = sst [smem:[#allocation20_spill]] %s2092_s20  ;;  %p1675_p5 = por %p53_p0, %p52_p13 }
  0x21   : > { %p1681_p7 = por %p194_p2, %p52_p13  ;;  %s42_s9 = ssub.s32 %s1548_s25, %s2092_s20 }
  0x22   : > { %s254_s11 = sand.u32 1, %s1540_s23   ;;  %p43_p9 = scmp.eq.s32.totalorder %s42_s9, 0 }
  0x23   : > { %s1101_s12 = sshll.u32 %s254_s11, 4  ;;  %s1119_s13 = sshll.u32 %s1548_s25, 4 }
  0x24   : > { %s1690_s14 = scalar_select %p43_p9, %s1540_s23, %s45_s28  }
  0x25   : > { %s263_s19 = scalar_lea.hbm %s2051_s0, %s1119_s13  ;;  %s258_s17 = scalar_lea.vmem [#allocation3], %s1101_s12 }
  0x26   : > { %2079 = sst [smem:[#allocation21_spill]] %s1690_s14  ;;  %s264_s16 = sshll.u32 %s263_s19, 4  ;;  %s265_s16 = int_to_ptr.hbm [resolvable:$true] %s264_s16 }
  0x27   : > { %s266_s2 = sshll.u32 %s258_s17, 4  ;;  %p1193_p2 = pnand %p1205_p3, %p1675_p5  ;;  %s267_s2 = int_to_ptr.vmem [resolvable:$true] %s266_s2 }
  0x28   : > { %s276_s3 = sand.u32 1, %s1552_s26   ;;  %s1104_s20 = sshll.u32 %s254_s11, 8 }
  0x29   : > { %s255_s30 = scalar_lea.sflag [#allocation4], %s254_s11  ;;  %s2080_s9 = smov 8  }
  0x2a   : > { %s2081_s21 = smov 128   ;;  %s1121_s28 = sshll.u32 %s1548_s25, 8 }
  0x2b   : > { %1195 = dma.hbm_to_vmem [thread:$0]  (!%p1193_p2), %s265_s16, 256, %s267_s2, %s255_s30, %s2081_s21, %s2081_s21, %s2080_s9  }
  0x2c   : > { %s280_s14 = scalar_lea.vmem [#allocation6], %s1104_s20  ;;  %s288_s12 = scalar_lea.hbm %s2052_s1, %s1121_s28 }
  0x2d   : > { %s291_s23 = sshll.u32 %s280_s14, 4  ;;  %s289_s17 = sshll.u32 %s288_s12, 4  ;;  %s292_s23 = int_to_ptr.vmem [resolvable:$true] %s291_s23  ;;  %s290_s17 = int_to_ptr.hbm [resolvable:$true] %s289_s17 }
  0x2e   : > { %s277_s7 = scalar_lea.sflag [#allocation7], %s276_s3  ;;  %303 = sbr.rel (%p1649_p8) target bundleno = 720 (0x2d0), region = 44 }
  0x2f   : > { %1198 = dma.hbm_to_vmem [thread:$0]  (!%p1193_p2), %s290_s17, 4096, %s292_s23, %s277_s7, %s2081_s21, %s2081_s21, %s2080_s9  }
  0x30   : > { %s1713_s2 = sand.u32 (!%p1649_p8), 1, %s1536_s22  }
  0x31   : > { %s1109_s30 = sshll.u32 (!%p1649_p8), %s1713_s2, 4  ;;  %s306_s16 = scalar_lea.sflag (!%p1649_p8), [#allocation4], %s1713_s2 }
  0x32   : > { %s1719_s20 = scalar_lea.vmem (!%p1649_p8), [#allocation3], %s1109_s30 }
  0x33   : > { %1511 = dma.done.wait (%p1636_p4), %s306_s16, 256  }
  0x34   : > { %1513 = vsyncadd (%p1636_p4), %s306_s16, 4294967040  ;;  %s315_s3 = sand.u32 1, %s1627_s27   ;;  %s1110_s21 = sshll.u32 %s1713_s2, 8 }
  0x35   : > { %s316_s23 = scalar_lea.sflag [#allocation7], %s315_s3  ;;  %s1727_s10 = scalar_lea.vmem [#allocation6], %s1110_s21 }
  0x36   : > { %1515 = dma.done.wait (%p1636_p4), %s316_s23, 4096  }
  0x37   : > { %1517 = vsyncadd (%p1636_p4), %s316_s23, 4294963200 }
  0x38   : > { %1519 = dma.done.wait (%p59_p1), [#allocation7], 2048  }
  0x39   : > { %1521 = vsyncadd (%p59_p1), [#allocation7], 4294965248 }
  0x3a   : > { %1523 = dma.done.wait (%p59_p1), [#allocation10], 2048  }
  0x3b   : > { %1525 = vsyncadd (%p59_p1), [#allocation10], 4294965248  ;;  %v385_v0 = vld [vmem:[#allocation8 + $0x78] sm:$0xff]  ;;  %v384_v2 = vld [vmem:[#allocation8 + $0x70] sm:$0xff]  ;;  %vm827_vm0 = vcmask 130112   ;;  %vm899_vm1 = vcmask 1047680  }
  0x3c   : > { %v1741_v1 = vld [vmem:[#allocation9 + $0x78] sm:$0xff]  ;;  %390 = vmatpush.msra.mxu0 %v385_v0  ;;  %v1744_v3 = vld [vmem:[#allocation9 + $0x70] sm:$0xff]  ;;  %v383_v4 = vld [vmem:[#allocation8 + $0x68] sm:$0xff]  ;;  %vm874_vm2 = vcmask 1041409   ;;  %vm876_vm3 = vcmask 1042434   ;;  %vm878_vm4 = vcmask 1043459  }
  0x3d   : > { %1123 = vmatpush.msra.mxu1 %v1741_v1  ;;  %1124 = vmatpush.msra.mxu2 %v1741_v1  ;;  %v1748_v5 = vld [vmem:[#allocation9 + $0x68] sm:$0xff]  ;;  %v382_v6 = vld [vmem:[#allocation8 + $0x60] sm:$0xff]  ;;  %v381_v8 = vld [vmem:[#allocation8 + $0x58] sm:$0xff]  ;;  %vm880_vm5 = vcmask 1044484   ;;  %vm882_vm6 = vcmask 1045509   ;;  %vm884_vm7 = vcmask 1046534  }
  0x3e   : > { %1125 = vmatpush.msra.mxu3 %v1741_v1  ;;  %391 = vmatpush.msra.mxu0 %v384_v2  ;;  %v1753_v7 = vld [vmem:[#allocation9 + $0x60] sm:$0xff]  ;;  %v1758_v9 = vld [vmem:[#allocation9 + $0x58] sm:$0xff]  ;;  %v380_v10 = vld [vmem:[#allocation8 + $0x50] sm:$0xff]  ;;  %vm886_vm8 = vcmask 1047559   ;;  %vm902_vm10 = vcmask 130048   ;;  %s1122_s18 = sshll.u32 %s1544_s24, 4 }
  0x3f   : > { %1126 = vmatpush.msra.mxu1 %v1744_v3  ;;  %1127 = vmatpush.msra.mxu2 %v1744_v3  ;;  %v1763_v11 = vld [vmem:[#allocation9 + $0x50] sm:$0xff]  ;;  %v379_v12 = vld [vmem:[#allocation8 + $0x48] sm:$0xff]  ;;  %v378_v14 = vld [vmem:[#allocation8 + $0x40] sm:$0xff]  ;;  %s965_s28 = scalar_lea.hbm %s2057_s6, %s1122_s18  ;;  %s363_s24 = scalar_lea.vmem [#allocation11], %s1109_s30 }
  0x40   : > { %1128 = vmatpush.msra.mxu3 %v1744_v3  ;;  %392 = vmatpush.msra.mxu0 %v383_v4  ;;  %v1768_v13 = vld [vmem:[#allocation9 + $0x48] sm:$0xff]  ;;  %v1773_v15 = vld [vmem:[#allocation9 + $0x40] sm:$0xff]  ;;  %v377_v16 = vld [vmem:[#allocation8 + $0x38] sm:$0xff]  ;;  %s966_s15 = sshll.u32 %s363_s24, 4  ;;  %s968_s13 = sshll.u32 %s965_s28, 4  ;;  %s967_s15 = int_to_ptr.vmem [resolvable:$true] %s966_s15  ;;  %s969_s13 = int_to_ptr.hbm [resolvable:$true] %s968_s13 }
  0x41   : > { %1129 = vmatpush.msra.mxu1 %v1748_v5  ;;  %1130 = vmatpush.msra.mxu2 %v1748_v5  ;;  %v1778_v17 = vld [vmem:[#allocation9 + $0x38] sm:$0xff]  ;;  %v376_v18 = vld [vmem:[#allocation8 + $0x30] sm:$0xff]  ;;  %v375_v20 = vld [vmem:[#allocation8 + $0x28] sm:$0xff]  ;;  %s954_s12 = scalar_lea.sflag [#allocation5], %s1713_s2  ;;  %s1472_s17 = sshra.s32 %s969_s13, 4  ;;  %s1473_s17 = int_to_ptr.hbm [resolvable:$true] %s1472_s17 }
  0x42   : > { %1131 = vmatpush.msra.mxu3 %v1748_v5  ;;  %393 = vmatpush.msra.mxu0 %v382_v6  ;;  %v1783_v19 = vld [vmem:[#allocation9 + $0x30] sm:$0xff]  ;;  %v1788_v21 = vld [vmem:[#allocation9 + $0x28] sm:$0xff]  ;;  %v374_v22 = vld [vmem:[#allocation8 + $0x20] sm:$0xff]  ;;  %s1474_s7 = scalar_lea.hbm %s1473_s17, 16  ;;  %p1479_p10 = scmp.lt.s32.totalorder %s1473_s17, %s2057_s6 }
  0x43   : > { %1132 = vmatpush.msra.mxu1 %v1753_v7  ;;  %1133 = vmatpush.msra.mxu2 %v1753_v7  ;;  %v1793_v23 = vld [vmem:[#allocation9 + $0x20] sm:$0xff]  ;;  %v373_v24 = vld [vmem:[#allocation8 + $0x18] sm:$0xff]  ;;  %v372_v26 = vld [vmem:[#allocation8 + $0x10] sm:$0xff]  ;;  %p1475_p1 = scmp.ne.s32.totalorder %s1473_s17, %s1474_s7 }
  0x44   : > { %1134 = vmatpush.msra.mxu3 %v1753_v7  ;;  %394 = vmatpush.msra.mxu0 %v381_v8  ;;  %v1798_v25 = vld [vmem:[#allocation9 + $0x18] sm:$0xff]  ;;  %v447_v27 = vld [vmem:[#allocation9 + $0x10] sm:$0xff]  ;;  %v371_v28 = vld [vmem:[#allocation8 + $0x8] sm:$0xff] }
  0x45   : > { %1135 = vmatpush.msra.mxu1 %v1758_v9  ;;  %1136 = vmatpush.msra.mxu2 %v1758_v9  ;;  %v446_v29 = vld [vmem:[#allocation9 + $0x8] sm:$0xff]  ;;  %v370_v30 = vld [vmem:[#allocation8] sm:$0xff]  ;;  %v427_v34 = vld [vmem:[%s1727_s10 + $0x70] sm:$0xff]  ;;  %p1476_p4 = pnand %p1475_p1, %p1681_p7 }
  0x46   : > { %1137 = vmatpush.msra.mxu3 %v1758_v9  ;;  %395 = vmatpush.msra.mxu0 %v380_v10  ;;  %v445_v31 = vld [vmem:[#allocation9] sm:$0xff]  ;;  %v418_v33 = vld [vmem:[%s1727_s10 + $0x28] sm:$0xff]  ;;  %v436_v35 = vld [vmem:[%s1727_s10 + $0xb8] sm:$0xff] }
  0x47   : > { %1138 = vmatpush.msra.mxu1 %v1763_v11  ;;  %1139 = vmatpush.msra.mxu2 %v1763_v11  ;;  %v368_v32 = vld [vmem:[%s1719_s20] sm:$0xff]  ;;  %v369_v36 = vld [vmem:[%s1719_s20 + $0x8] sm:$0xff]  ;;  %p1477_p8 = pneg %p1476_p4  ;;  %s1478_s20 = scalar_lea.hbm %s2057_s6, 32 }
  0x48   : > { %1140 = vmatpush.msra.mxu3 %v1763_v11  ;;  %396 = vmatpush.msra.mxu0 %v379_v12  ;;  %v419_v37 = vld [vmem:[%s1727_s10 + $0x30] sm:$0xff]  ;;  %v428_v38 = vld [vmem:[%s1727_s10 + $0x78] sm:$0xff]  ;;  %v437_v39 = vld [vmem:[%s1727_s10 + $0xc0] sm:$0xff]  ;;  %p1480_p12 = scmp.lt.s32.totalorder %s1478_s20, %s1474_s7 }
  0x49   : > { %1141 = vmatpush.msra.mxu1 %v1768_v13  ;;  %1142 = vmatpush.msra.mxu2 %v1768_v13  ;;  %v420_v40 = vld [vmem:[%s1727_s10 + $0x38] sm:$0xff]  ;;  %v429_v41 = vld [vmem:[%s1727_s10 + $0x80] sm:$0xff]  ;;  %v438_v42 = vld [vmem:[%s1727_s10 + $0xc8] sm:$0xff] }
  0x4a   : > { %1143 = vmatpush.msra.mxu3 %v1768_v13  ;;  %397 = vmatpush.msra.mxu0 %v378_v14  ;;  %v421_v43 = vld [vmem:[%s1727_s10 + $0x40] sm:$0xff]  ;;  %v430_v44 = vld [vmem:[%s1727_s10 + $0x88] sm:$0xff]  ;;  %v439_v45 = vld [vmem:[%s1727_s10 + $0xd0] sm:$0xff]  ;;  %p1481_p13 = por %p1480_p12, %p1479_p10 }
  0x4b   : > { %1144 = vmatpush.msra.mxu1 %v1773_v15  ;;  %1145 = vmatpush.msra.mxu2 %v1773_v15  ;;  %v413_v46 = vld [vmem:[%s1727_s10] sm:$0xff]  ;;  %v422_v47 = vld [vmem:[%s1727_s10 + $0x48] sm:$0xff]  ;;  %v431_v48 = vld [vmem:[%s1727_s10 + $0x90] sm:$0xff] }
  0x4c   : > { %1146 = vmatpush.msra.mxu3 %v1773_v15  ;;  %398 = vmatpush.msra.mxu0 %v377_v16  ;;  %v440_v49 = vld [vmem:[%s1727_s10 + $0xd8] sm:$0xff]  ;;  %v414_v50 = vld [vmem:[%s1727_s10 + $0x8] sm:$0xff]  ;;  %v423_v51 = vld [vmem:[%s1727_s10 + $0x50] sm:$0xff]  ;;  %p1482_p0 = pnand %p1481_p13, %p1477_p8 }
  0x4d   : > { %1147 = vmatpush.msra.mxu1 %v1778_v17  ;;  %1148 = vmatpush.msra.mxu2 %v1778_v17  ;;  %v432_v52 = vld [vmem:[%s1727_s10 + $0x98] sm:$0xff]  ;;  %v441_v53 = vld [vmem:[%s1727_s10 + $0xe0] sm:$0xff]  ;;  %v415_v54 = vld [vmem:[%s1727_s10 + $0x10] sm:$0xff] }
  0x4e   : > { %1149 = vmatpush.msra.mxu3 %v1778_v17  ;;  %399 = vmatpush.msra.mxu0 %v376_v18  ;;  %v424_v55 = vld [vmem:[%s1727_s10 + $0x58] sm:$0xff]  ;;  %v433_v56 = vld [vmem:[%s1727_s10 + $0xa0] sm:$0xff]  ;;  %v442_v57 = vld [vmem:[%s1727_s10 + $0xe8] sm:$0xff] }
  0x4f   : > { %1150 = vmatpush.msra.mxu1 %v1783_v19  ;;  %1151 = vmatpush.msra.mxu2 %v1783_v19  ;;  %v416_v58 = vld [vmem:[%s1727_s10 + $0x18] sm:$0xff]  ;;  %v425_v59 = vld [vmem:[%s1727_s10 + $0x60] sm:$0xff]  ;;  %v434_v60 = vld [vmem:[%s1727_s10 + $0xa8] sm:$0xff] }
  0x50   : > { %1152 = vmatpush.msra.mxu3 %v1783_v19  ;;  %400 = vmatpush.msra.mxu0 %v375_v20  ;;  %v443_v61 = vld [vmem:[%s1727_s10 + $0xf0] sm:$0xff]  ;;  %v417_v62 = vld [vmem:[%s1727_s10 + $0x20] sm:$0xff]  ;;  %v426_v63 = vld [vmem:[%s1727_s10 + $0x68] sm:$0xff] }
  0x51   : > { %1153 = vmatpush.msra.mxu1 %v1788_v21  ;;  %1154 = vmatpush.msra.mxu2 %v1788_v21  ;;  %v435_v0 = vld [vmem:[%s1727_s10 + $0xb0] sm:$0xff] }
  0x52   : > { %1155 = vmatpush.msra.mxu3 %v1788_v21  ;;  %401 = vmatpush.msra.mxu0 %v374_v22  ;;  %v1264_v2 = vld [vmem:[%s2055_s4] ss:$0 sm:$0xff] }
  0x53   : > { %1156 = vmatpush.msra.mxu1 %v1793_v23  ;;  %1157 = vmatpush.msra.mxu2 %v1793_v23 }
  0x54   : > { %1158 = vmatpush.msra.mxu3 %v1793_v23  ;;  %402 = vmatpush.msra.mxu0 %v373_v24 }
  0x55   : > { %1159 = vmatpush.msra.mxu1 %v1798_v25  ;;  %1160 = vmatpush.msra.mxu2 %v1798_v25 }
  0x56   : > { %1161 = vmatpush.msra.mxu3 %v1798_v25  ;;  %403 = vmatpush.msra.mxu0 %v372_v26 }
  0x57   : > { %1162 = vmatpush.msra.mxu1 %v447_v27  ;;  %1163 = vmatpush.msra.mxu2 %v447_v27 }
  0x58   : > { %1164 = vmatpush.msra.mxu3 %v447_v27  ;;  %404 = vmatpush.msra.mxu0 %v371_v28 }
  0x59   : > { %1165 = vmatpush.msra.mxu1 %v446_v29  ;;  %1166 = vmatpush.msra.mxu2 %v446_v29 }
  0x5a   : > { %1167 = vmatpush.msra.mxu3 %v446_v29  ;;  %405 = vmatpush.msra.mxu0 %v370_v30 }
  0x5b   : > { %1168 = vmatpush.msra.mxu1 %v445_v31  ;;  %1169 = vmatpush.msra.mxu2 %v445_v31 }
  0x5c   : > { %1170 = vmatpush.msra.mxu3 %v445_v31  ;;  %406 = vmatmul.f32.vlgmr.msra.gmra.mxu0 %v368_v32 }
  0x5d   : > { %492 = vmatmul.f32.vlgmr.msra.gmra.mxu1 %v418_v33  ;;  %461 = vmatpush.msrb.mxu0 %v1741_v1  ;;  %v444_v1 = vld [vmem:[%s1727_s10 + $0xf8] sm:$0xff] }
  0x5e   : > { %519 = vmatmul.f32.vlgmr.msra.gmra.mxu2 %v427_v34  ;;  %546 = vmatmul.f32.vlgmr.msra.gmra.mxu3 %v436_v35 }
  0x5f   : > { %462 = vmatpush.msrb.mxu0 %v1744_v3 }
  0x61   : > { %463 = vmatpush.msrb.mxu0 %v1748_v5 }
  0x63   : > { %464 = vmatpush.msrb.mxu0 %v1753_v7 }
  0x64   : > { %409 = vmatmul.f32.gmra.mxu0 %v369_v36 }
  0x65   : > { %495 = vmatmul.f32.gmra.mxu1 %v419_v37  ;;  %465 = vmatpush.msrb.mxu0 %v1758_v9 }
  0x66   : > { %522 = vmatmul.f32.gmra.mxu2 %v428_v38  ;;  %549 = vmatmul.f32.gmra.mxu3 %v437_v39 }
  0x67   : > { %466 = vmatpush.msrb.mxu0 %v1763_v11 }
  0x69   : > { %467 = vmatpush.msrb.mxu0 %v1768_v13 }
  0x6b   : > { %468 = vmatpush.msrb.mxu0 %v1773_v15 }
  0x6d   : > { %498 = vmatmul.f32.gmra.mxu1 %v420_v40  ;;  %469 = vmatpush.msrb.mxu0 %v1778_v17 }
  0x6e   : > { %525 = vmatmul.f32.gmra.mxu2 %v429_v41  ;;  %552 = vmatmul.f32.gmra.mxu3 %v438_v42 }
  0x6f   : > { %470 = vmatpush.msrb.mxu0 %v1783_v19 }
  0x71   : > { %471 = vmatpush.msrb.mxu0 %v1788_v21  ;;  %v1870_v21 = vld [vmem:[%s2056_s5] ss:$0 sm:$0xff] }
  0x73   : > { %472 = vmatpush.msrb.mxu0 %v1793_v23 }
  0x75   : > { %501 = vmatmul.f32.gmra.mxu1 %v421_v43  ;;  %473 = vmatpush.msrb.mxu0 %v1798_v25 }
  0x76   : > { %528 = vmatmul.f32.gmra.mxu2 %v430_v44  ;;  %555 = vmatmul.f32.gmra.mxu3 %v439_v45 }
  0x77   : > { %474 = vmatpush.msrb.mxu0 %v447_v27 }
  0x79   : > { %475 = vmatpush.msrb.mxu0 %v446_v29 }
  0x7b   : > { %476 = vmatpush.msrb.mxu0 %v445_v31 }
  0x7c   : > { %477 = vmatmul.f32.vlgmr.msrb.gmra.mxu0 %v413_v46 }
  0x7d   : > { %504 = vmatmul.f32.gmra.mxu1 %v422_v47 }
  0x7e   : > { %531 = vmatmul.f32.gmra.mxu2 %v431_v48  ;;  %558 = vmatmul.f32.gmra.mxu3 %v440_v49 }
  0x84   : > { %480 = vmatmul.f32.gmra.mxu0 %v414_v50 }
  0x85   : > { %507 = vmatmul.f32.gmra.mxu1 %v423_v51 }
  0x86   : > { %534 = vmatmul.f32.gmra.mxu2 %v432_v52  ;;  %561 = vmatmul.f32.gmra.mxu3 %v441_v53 }
  0x8c   : > { %483 = vmatmul.f32.gmra.mxu0 %v415_v54 }
  0x8d   : > { %510 = vmatmul.f32.gmra.mxu1 %v424_v55 }
  0x8e   : > { %537 = vmatmul.f32.gmra.mxu2 %v433_v56  ;;  %564 = vmatmul.f32.gmra.mxu3 %v442_v57 }
  0x94   : > { %486 = vmatmul.f32.gmra.mxu0 %v416_v58 }
  0x95   : > { %513 = vmatmul.f32.gmra.mxu1 %v425_v59 }
  0x96   : > { %540 = vmatmul.f32.gmra.mxu2 %v434_v60  ;;  %567 = vmatmul.f32.gmra.mxu3 %v443_v61 }
  0x9c   : > { %489 = vmatmul.f32.gmra.mxu0 %v417_v62 }
  0x9d   : > { %516 = vmatmul.f32.gmra.mxu1 %v426_v63 }
  0x9e   : > { %543 = vmatmul.f32.gmra.mxu2 %v435_v0  ;;  %570 = vmatmul.f32.gmra.mxu3 %v444_v1 }
  0xd9   : > { %v407_v3 = vpop.f32.mrf.mxu0 }
  0xda   : > { %v493_v4 = vpop.f32.mrf.mxu1  ;;  %v1856_v5 = vadd.f32 %v1264_v2, %v407_v3 }
  0xdc   : > { %v577_v6 = vrot.slane %v1856_v5, 2  ;;  %v582_v7 = vrot.slane %v1856_v5, 7  ;;  %v578_v8 = vrot.slane %v1856_v5, 3  ;;  %v579_v39 = vrot.slane %v1856_v5, 4 }
  0xdd   : > { %v590_v58 = vperm.slane %v1856_v5, 0 }
  0xde   : > { %v1861_v9 = vperm.slane %v577_v6, 0  ;;  %v597_v10 = vperm.slane %v582_v7, 0  ;;  %v593_v11 = vperm.slane %v578_v8, 0  ;;  %v594_v46 = vperm.slane %v579_v39, 0 }
  0xe0   : > { %v627_v12 = vadd.f32 %v1861_v9, %v493_v4 }
  0xe1   : > { %v520_v13 = vpop.f32.mrf.mxu2  ;;  %v547_v15 = vpop.f32.mrf.mxu3 }
  0xe2   : > { %v636_v14 = vadd.f32 %v597_v10, %v520_v13  ;;  %v410_v16 = vpop.f32.mrf.mxu0  ;;  %1266 = vtanh.f32 %v627_v12  ;;  %v496_v18 = vpop.f32.mrf.mxu1 }
  0xe3   : > { %v1864_v17 = vadd.f32 %v1264_v2, %v410_v16  ;;  %v628_v19 = vadd.f32 %v593_v11, %v496_v18 }
  0xe4   : > { %1268 = vtanh.f32 %v636_v14  ;;  %v576_v14 = vrot.slane %v1856_v5, 1 }
  0xe5   : > { %v585_v20 = vrot.slane %v1864_v17, 3  ;;  %1270 = vtanh.f32 %v628_v19  ;;  %v586_v33 = vrot.slane %v1864_v17, 4  ;;  %v598_v35 = vperm.slane %v1864_v17, 0 }
  0xe6   : > { %v587_v54 = vrot.slane %v1864_v17, 5  ;;  %v583_v18 = vrot.slane %v1864_v17, 1 }
  0xe7   : > { %v1872_v24 = vperm.slane %v585_v20, 0  ;;  %v602_v37 = vperm.slane %v586_v33, 0 }
  0xe8   : > { %v1267_v22 = vpop.eup %1266  ;;  %v603_v63 = vperm.slane %v587_v54, 0 }
  0xe9   : > { %v523_v23 = vpop.f32.mrf.mxu2  ;;  %v550_v27 = vpop.f32.mrf.mxu3  ;;  %v695_v28 = vmul.f32 %v1267_v22, %v1870_v21  ;;  %v645_v34 = vadd.f32 %v1872_v24, %v547_v15  ;;  %v580_v22 = vrot.slane %v1856_v5, 5 }
  0xea   : > { %v1269_v25 = vpop.eup %1268  ;;  %v1874_v26 = vadd.f32 %v597_v10, %v523_v23  ;;  %v499_v29 = vpop.f32.mrf.mxu1  ;;  %v646_v45 = vadd.f32 %v602_v37, %v550_v27  ;;  %v591_v23 = vperm.slane %v576_v14, 0 }
  0xeb   : > { %v704_v30 = vmul.f32 %v1269_v25, %v1870_v21  ;;  %v629_v31 = vadd.f32 %v593_v11, %v499_v29  ;;  %732 = vadd.xlane.f32.xlu0 %v695_v28  ;;  %v1271_v32 = vpop.eup %1270  ;;  %v599_v29 = vperm.slane %v583_v18, 0  ;;  %v589_v18 = vrot.slane %v1864_v17, 7 }
  0xec   : > { %v696_v36 = vmul.f32 %v1271_v32, %v1870_v21  ;;  %v595_v32 = vperm.slane %v580_v22, 0 }
  0xed   : > { %750 = vadd.xlane.f32.xlu1 %v704_v30  ;;  %1272 = vtanh.f32 %v629_v31 }
  0xee   : > { %1274 = vtanh.f32 %v645_v34 }
  0xf1   : > { %v526_v38 = vpop.f32.mrf.mxu2  ;;  %v553_v41 = vpop.f32.mrf.mxu3 }
  0xf2   : > { %v638_v40 = vadd.f32 %v598_v35, %v526_v38  ;;  %v647_v42 = vadd.f32 %v602_v37, %v553_v41  ;;  %v502_v43 = vpop.f32.mrf.mxu1 }
  0xf3   : > { %v1273_v44 = vpop.eup %1272  ;;  %734 = vadd.xlane.f32.xlu0 %v696_v36  ;;  %v630_v49 = vadd.f32 %v594_v46, %v502_v43 }
  0xf4   : > { %1276 = vtanh.f32 %v638_v40  ;;  %v697_v47 = vmul.f32 %v1273_v44, %v1870_v21  ;;  %v1275_v48 = vpop.eup %1274  ;;  %v588_v40 = vrot.slane %v1864_v17, 6 }
  0xf5   : > { %1278 = vtanh.f32 %v647_v42  ;;  %v713_v56 = vmul.f32 %v1275_v48, %v1870_v21 }
  0xf6   : > { %736 = vadd.xlane.f32.xlu1 %v697_v47  ;;  %1280 = vtanh.f32 %v646_v45  ;;  %v604_v47 = vperm.slane %v588_v40, 0 }
  0xf7   : > { %1282 = vtanh.f32 %v630_v49 }
  0xf9   : > { %v529_v50 = vpop.f32.mrf.mxu2  ;;  %v556_v53 = vpop.f32.mrf.mxu3 }
  0xfa   : > { %v1277_v51 = vpop.eup %1276  ;;  %v639_v52 = vadd.f32 %v598_v35, %v529_v50  ;;  %v478_v55 = vpop.f32.mrf.mxu0  ;;  %v648_v2 = vadd.f32 %v603_v63, %v556_v53 }
  0xfb   : > { %v1279_v57 = vpop.eup %1278  ;;  %v505_v59 = vpop.f32.mrf.mxu1  ;;  %v706_v60 = vmul.f32 %v1277_v51, %v1870_v21  ;;  %768 = vadd.xlane.f32.xlu0 %v713_v56  ;;  %v622_v62 = vadd.f32 %v590_v58, %v478_v55  ;;  %v584_v56 = vrot.slane %v1864_v17, 2 }
  0xfc   : > { %1284 = vtanh.f32 %v639_v52  ;;  %v715_v61 = vmul.f32 %v1279_v57, %v1870_v21  ;;  %v631_v0 = vadd.f32 %v594_v46, %v505_v59  ;;  %v1281_v1 = vpop.eup %1280 }
  0xfd   : > { %754 = vadd.xlane.f32.xlu2 %v706_v60  ;;  %v1283_v3 = vpop.eup %1282  ;;  %1286 = vtanh.f32 %v622_v62  ;;  %v714_v7 = vmul.f32 %v1281_v1, %v1870_v21 }
  0xfe   : > { %772 = vadd.xlane.f32.xlu1 %v715_v61  ;;  %1288 = vtanh.f32 %v631_v0  ;;  %v698_v13 = vmul.f32 %v1283_v3, %v1870_v21  ;;  %v600_v0 = vperm.slane %v584_v56, 0  ;;  %v581_v3 = vrot.slane %v1856_v5, 6 }
  0xff   : > { %1290 = vtanh.f32 %v648_v2 }
 0x101   : > { %v532_v8 = vpop.f32.mrf.mxu2  ;;  %v559_v10 = vpop.f32.mrf.mxu3 }
 0x102   : > { %v1285_v4 = vpop.eup %1284  ;;  %v481_v6 = vpop.f32.mrf.mxu0  ;;  %v649_v15 = vadd.f32 %v603_v63, %v559_v10  ;;  %v640_v33 = vadd.f32 %v599_v29, %v532_v8 }
 0x103   : > { %v707_v11 = vmul.f32 %v1285_v4, %v1870_v21  ;;  %770 = vadd.xlane.f32.xlu0 %v714_v7  ;;  %v623_v12 = vadd.f32 %v590_v58, %v481_v6  ;;  %v1287_v16 = vpop.eup %1286  ;;  %v508_v19 = vpop.f32.mrf.mxu1 }
 0x104   : > { %v1289_v20 = vpop.eup %1288  ;;  %v690_v28 = vmul.f32 %v1287_v16, %v1870_v21  ;;  %v632_v36 = vadd.f32 %v595_v32, %v508_v19 }
 0x105   : > { %756 = vadd.xlane.f32.xlu2 %v707_v11  ;;  %1292 = vtanh.f32 %v623_v12  ;;  %v1291_v25 = vpop.eup %1290  ;;  %v699_v31 = vmul.f32 %v1289_v20, %v1870_v21  ;;  %v596_v11 = vperm.slane %v581_v3, 0 }
 0x106   : > { %738 = vadd.xlane.f32.xlu1 %v698_v13  ;;  %1294 = vtanh.f32 %v649_v15  ;;  %v716_v35 = vmul.f32 %v1291_v25, %v1870_v21  ;;  %v605_v25 = vperm.slane %v589_v18, 0 }
 0x109   : > { %v535_v34 = vpop.f32.mrf.mxu2  ;;  %v562_v38 = vpop.f32.mrf.mxu3 }
 0x10a   : > { %v484_v27 = vpop.f32.mrf.mxu0  ;;  %v650_v50 = vadd.f32 %v604_v47, %v562_v38  ;;  %v641_v54 = vadd.f32 %v599_v29, %v535_v34 }
 0x10b   : > { %v624_v30 = vadd.f32 %v591_v23, %v484_v27  ;;  %722 = vadd.xlane.f32.xlu0 %v690_v28  ;;  %v1293_v37 = vpop.eup %1292  ;;  %v511_v41 = vpop.f32.mrf.mxu1 }
 0x10c   : > { %v1295_v39 = vpop.eup %1294  ;;  %v691_v43 = vmul.f32 %v1293_v37, %v1870_v21  ;;  %v633_v48 = vadd.f32 %v595_v32, %v511_v41 }
 0x10d   : > { %740 = vadd.xlane.f32.xlu2 %v699_v31  ;;  %1296 = vtanh.f32 %v624_v30  ;;  %v717_v45 = vmul.f32 %v1295_v39, %v1870_v21 }
 0x10e   : > { %774 = vadd.xlane.f32.xlu1 %v716_v35  ;;  %1298 = vtanh.f32 %v640_v33 }
 0x10f   : > { %1300 = vtanh.f32 %v632_v36 }
 0x111   : > { %v538_v52 = vpop.f32.mrf.mxu2  ;;  %v565_v55 = vpop.f32.mrf.mxu3 }
 0x112   : > { %v487_v42 = vpop.f32.mrf.mxu0  ;;  %v651_v62 = vadd.f32 %v604_v47, %v565_v55  ;;  %v642_v6 = vadd.f32 %v600_v0, %v538_v52  ;;  %v787_v47 = vlaneseq }
 0x113   : > { %v625_v44 = vadd.f32 %v591_v23, %v487_v42  ;;  %v1297_v46 = vpop.eup %1296  ;;  %724 = vadd.xlane.f32.xlu0 %v691_v43  ;;  %v514_v58 = vpop.f32.mrf.mxu1 }
 0x114   : > { %v692_v49 = vmul.f32 %v1297_v46, %v1870_v21  ;;  %v1299_v51 = vpop.eup %1298  ;;  %v634_v14 = vadd.f32 %v596_v11, %v514_v58 }
 0x115   : > { %776 = vadd.xlane.f32.xlu2 %v717_v45  ;;  %1302 = vtanh.f32 %v625_v44  ;;  %v1301_v53 = vpop.eup %1300  ;;  %v708_v57 = vmul.f32 %v1299_v51, %v1870_v21 }
 0x116   : > { %726 = vadd.xlane.f32.xlu1 %v692_v49  ;;  %1304 = vtanh.f32 %v633_v48  ;;  %v700_v60 = vmul.f32 %v1301_v53, %v1870_v21  ;;  %v1926_v49 = vand.u32 127, %v787_v47 }
 0x117   : > { %1306 = vtanh.f32 %v650_v50 }
 0x118   : > { %1308 = vtanh.f32 %v641_v54  ;;  %v1929_v50 = vadd.s32 4294967288, %v1926_v49  ;;  %vm791_vm9 = vcmp.lt.s32.totalorder %v1926_v49, 10 }
 0x119   : > { %1310 = vtanh.f32 %v651_v62  ;;  %v541_v7 = vpop.f32.mrf.mxu2  ;;  %v568_v12 = vpop.f32.mrf.mxu3 }
 0x11a   : > { %v490_v59 = vpop.f32.mrf.mxu0  ;;  %v643_v15 = vadd.f32 %v600_v0, %v541_v7  ;;  %v652_v29 = vadd.f32 %v605_v25, %v568_v12 }
 0x11b   : > { %v1303_v61 = vpop.eup %1302  ;;  %758 = vadd.xlane.f32.xlu0 %v708_v57  ;;  %v626_v1 = vadd.f32 %v1861_v9, %v490_v59  ;;  %v517_v9 = vpop.f32.mrf.mxu1 }
 0x11c   : > { %v693_v63 = vmul.f32 %v1303_v61, %v1870_v21  ;;  %v1305_v2 = vpop.eup %1304  ;;  %v635_v20 = vadd.f32 %v596_v11, %v517_v9 }
 0x11d   : > { %742 = vadd.xlane.f32.xlu2 %v700_v60  ;;  %v1307_v4 = vpop.eup %1306  ;;  %1312 = vtanh.f32 %v626_v1  ;;  %v701_v10 = vmul.f32 %v1305_v2, %v1870_v21 }
 0x11e   : > { %728 = vadd.xlane.f32.xlu1 %v693_v63  ;;  %v1309_v8 = vpop.eup %1308  ;;  %v718_v13 = vmul.f32 %v1307_v4, %v1870_v21  ;;  %1314 = vtanh.f32 %v642_v6 }
 0x11f   : > { %v709_v5 = vmul.f32 %v1309_v8, %v1870_v21  ;;  %v1311_v16 = vpop.eup %1310  ;;  %1316 = vtanh.f32 %v634_v14  ;;  %v1558_v8 = vmov -1e+30  }
 0x120   : > { %1318 = vtanh.f32 %v643_v15  ;;  %v719_v23 = vmul.f32 %v1311_v16, %v1870_v21  ;;  %901 = vst.msk [vmem:[#allocation2 + $0x8] sm:$0xff] %vm899_vm1, %v1558_v8 }
 0x121   : > { %v544_v27 = vpop.f32.mrf.mxu2  ;;  %1320 = vtanh.f32 %v635_v20  ;;  %v571_v30 = vpop.f32.mrf.mxu3  ;;  %900 = vst.msk [vmem:[#allocation2] sm:$0xff] %vm899_vm1, %v1558_v8 }
 0x122   : > { %v644_v17 = vadd.f32 %v1872_v24, %v544_v27  ;;  %v653_v34 = vadd.f32 %v605_v25, %v571_v30  ;;  %1322 = vtanh.f32 %v652_v29 }
 0x123   : > { %744 = vadd.xlane.f32.xlu0 %v701_v10  ;;  %v1313_v19 = vpop.eup %1312 }
 0x124   : > { %v1315_v22 = vpop.eup %1314  ;;  %v694_v28 = vmul.f32 %v1313_v19, %v1870_v21  ;;  %1324 = vtanh.f32 %v644_v17 }
 0x125   : > { %778 = vadd.xlane.f32.xlu2 %v718_v13  ;;  %v710_v31 = vmul.f32 %v1315_v22, %v1870_v21  ;;  %v1317_v32 = vpop.eup %1316  ;;  %1326 = vtanh.f32 %v653_v34 }
 0x126   : > { %760 = vadd.xlane.f32.xlu1 %v709_v5  ;;  %v1319_v33 = vpop.eup %1318  ;;  %v702_v36 = vmul.f32 %v1317_v32, %v1870_v21  ;;  %1328 = vtanh.f32 %v1874_v26 }
 0x127   : > { %v1321_v35 = vpop.eup %1320  ;;  %v711_v37 = vmul.f32 %v1319_v33, %v1870_v21 }
 0x128   : > { %v703_v38 = vmul.f32 %v1321_v35, %v1870_v21  ;;  %v1323_v39 = vpop.eup %1322 }
 0x129   : > { %v720_v41 = vmul.f32 %v1323_v39, %v1870_v21 }
 0x12a   : > { %v1325_v40 = vpop.eup %1324 }
 0x12b   : > { %780 = vadd.xlane.f32.xlu0 %v719_v23  ;;  %v1327_v24 = vpop.eup %1326  ;;  %v712_v42 = vmul.f32 %v1325_v40, %v1870_v21 }
 0x12c   : > { %v721_v43 = vmul.f32 %v1327_v24, %v1870_v21  ;;  %v1329_v44 = vpop.eup %1328 }
 0x12d   : > { %730 = vadd.xlane.f32.xlu2 %v694_v28  ;;  %v705_v45 = vmul.f32 %v1329_v44, %v1870_v21 }
 0x12e   : > { %762 = vadd.xlane.f32.xlu1 %v710_v31 }
 0x133   : > { %746 = vadd.xlane.f32.xlu0 %v702_v36 }
 0x135   : > { %764 = vadd.xlane.f32.xlu2 %v711_v37 }
 0x136   : > { %748 = vadd.xlane.f32.xlu1 %v703_v38 }
 0x13b   : > { %782 = vadd.xlane.f32.xlu0 %v720_v41 }
 0x13d   : > { %766 = vadd.xlane.f32.xlu2 %v712_v42 }
 0x13e   : > { %784 = vadd.xlane.f32.xlu1 %v721_v43 }
 0x145   : > { %752 = vadd.xlane.f32.xlu2 %v705_v45 }
 0x15e   : > { %v733_v46 = vpop.xlane.xlu0 %732 }
 0x15f   : > { %v833_v16 = vperm.slane %v733_v46, %v1929_v50 }
 0x160   : > { %v1924_v48 = vpop.xlane.xlu1 %750 }
 0x166   : > { %v735_v26 = vpop.xlane.xlu0 %734 }
 0x167   : > { %v835_v52 = vperm.slane %v735_v26, %v1926_v49 }
 0x169   : > { %v737_v51 = vpop.xlane.xlu1 %736 }
 0x16a   : > { %v836_v53 = vperm.slane %v737_v51, %v1929_v50 }
 0x16c   : > { %v837_v54 = vsel %vm827_vm0, %v836_v53, %v835_v52 }
 0x16e   : > { %v1934_v21 = vpop.xlane.xlu0 %768 }
 0x16f   : > { %v860_v41 = vperm.slane %v1934_v21, %v1929_v50 }
 0x170   : > { %v755_v55 = vpop.xlane.xlu2 %754 }
 0x171   : > { %v773_v56 = vpop.xlane.xlu1 %772  ;;  %v850_v39 = vperm.slane %v755_v55, %v1926_v49 }
 0x172   : > { %v863_v36 = vperm.slane %v773_v56, %v1929_v50 }
 0x176   : > { %v771_v57 = vpop.xlane.xlu0 %770 }
 0x177   : > { %v862_v17 = vperm.slane %v771_v57, %v1926_v49 }
 0x178   : > { %v757_v58 = vpop.xlane.xlu2 %756 }
 0x179   : > { %v739_v59 = vpop.xlane.xlu1 %738  ;;  %v851_v33 = vperm.slane %v757_v58, %v1929_v50  ;;  %v864_v42 = vsel %vm827_vm0, %v863_v36, %v862_v17 }
 0x17a   : > { %v838_v40 = vperm.slane %v739_v59, %v1926_v49 }
 0x17b   : > { %v852_v46 = vsel %vm827_vm0, %v851_v33, %v850_v39 }
 0x17e   : > { %v723_v60 = vpop.xlane.xlu0 %722 }
 0x17f   : > { %v824_v9 = vperm.slane %v723_v60, %v1926_v49 }
 0x180   : > { %v741_v61 = vpop.xlane.xlu2 %740 }
 0x181   : > { %v775_v62 = vpop.xlane.xlu1 %774  ;;  %v839_v34 = vperm.slane %v741_v61, %v1929_v50 }
 0x182   : > { %v865_v43 = vperm.slane %v775_v62, %v1926_v49 }
 0x183   : > { %v840_v47 = vsel %vm827_vm0, %v839_v34, %v838_v40 }
 0x186   : > { %v725_v63 = vpop.xlane.xlu0 %724 }
 0x187   : > { %v826_v12 = vperm.slane %v725_v63, %v1929_v50 }
 0x188   : > { %v777_v0 = vpop.xlane.xlu2 %776 }
 0x189   : > { %v727_v1 = vpop.xlane.xlu1 %726  ;;  %v828_v19 = vsel %vm827_vm0, %v826_v12, %v824_v9  ;;  %v866_v37 = vperm.slane %v777_v0, %v1929_v50  ;;  %v847_v12 = vperm.slane %v1924_v48, %v1926_v49 }
 0x18a   : > { %v829_v13 = vperm.slane %v727_v1, %v1926_v49 }
 0x18b   : > { %v867_v51 = vsel %vm827_vm0, %v866_v37, %v865_v43 }
 0x18e   : > { %v759_v2 = vpop.xlane.xlu0 %758 }
 0x18f   : > { %v853_v35 = vperm.slane %v759_v2, %v1926_v49 }
 0x190   : > { %v1936_v3 = vpop.xlane.xlu2 %742 }
 0x191   : > { %v729_v4 = vpop.xlane.xlu1 %728  ;;  %v841_v58 = vperm.slane %v1936_v3, %v1926_v49 }
 0x192   : > { %v830_v11 = vperm.slane %v729_v4, %v1929_v50 }
 0x194   : > { %v831_v5 = vsel %vm827_vm0, %v830_v11, %v829_v13 }
 0x195   : > { %v875_v22 = vsel %vm874_vm2, %v831_v5, %v828_v19 }
 0x196   : > { %v1938_v6 = vpop.xlane.xlu0 %744 }
 0x197   : > { %v842_v62 = vperm.slane %v1938_v6, %v1929_v50 }
 0x198   : > { %v1940_v7 = vpop.xlane.xlu2 %778 }
 0x199   : > { %v761_v10 = vpop.xlane.xlu1 %760  ;;  %v868_v59 = vperm.slane %v1940_v7, %v1926_v49  ;;  %v843_v13 = vsel %vm827_vm0, %v842_v62, %v841_v58 }
 0x19a   : > { %v854_v31 = vperm.slane %v761_v10, %v1929_v50 }
 0x19c   : > { %v855_v24 = vsel %vm827_vm0, %v854_v31, %v853_v35 }
 0x19d   : > { %v888_v52 = vsel %vm874_vm2, %v855_v24, %v852_v46 }
 0x19e   : > { %v781_v14 = vpop.xlane.xlu0 %780 }
 0x19f   : > { %v869_v53 = vperm.slane %v781_v14, %v1929_v50 }
 0x1a0   : > { %v731_v15 = vpop.xlane.xlu2 %730 }
 0x1a1   : > { %v832_v18 = vperm.slane %v731_v15, %v1926_v49  ;;  %v763_v20 = vpop.xlane.xlu1 %762  ;;  %v870_v1 = vsel %vm827_vm0, %v869_v53, %v868_v59 }
 0x1a2   : > { %v856_v38 = vperm.slane %v763_v20, %v1926_v49 }
 0x1a3   : > { %v834_v23 = vsel %vm827_vm0, %v833_v16, %v832_v18 }
 0x1a4   : > { %v877_v25 = vsel %vm876_vm3, %v834_v23, %v875_v22 }
 0x1a5   : > { %v879_v27 = vsel %vm878_vm4, %v837_v54, %v877_v25 }
 0x1a6   : > { %v747_v28 = vpop.xlane.xlu0 %746  ;;  %v881_v4 = vsel %vm880_vm5, %v840_v47, %v879_v27 }
 0x1a7   : > { %v844_v2 = vperm.slane %v747_v28, %v1926_v49  ;;  %v883_v5 = vsel %vm882_vm6, %v843_v13, %v881_v4 }
 0x1a8   : > { %v765_v29 = vpop.xlane.xlu2 %764 }
 0x1a9   : > { %v749_v30 = vpop.xlane.xlu1 %748  ;;  %v857_v32 = vperm.slane %v765_v29, %v1929_v50 }
 0x1aa   : > { %v845_v60 = vperm.slane %v749_v30, %v1929_v50 }
 0x1ab   : > { %v858_v44 = vsel %vm827_vm0, %v857_v32, %v856_v38 }
 0x1ac   : > { %v889_v55 = vsel %vm876_vm3, %v858_v44, %v888_v52  ;;  %v846_v8 = vsel %vm827_vm0, %v845_v60, %v844_v2 }
 0x1ad   : > { %v885_v15 = vsel %vm884_vm7, %v846_v8, %v883_v5 }
 0x1ae   : > { %v783_v54 = vpop.xlane.xlu0 %782 }
 0x1af   : > { %v871_v63 = vperm.slane %v783_v54, %v1926_v49 }
 0x1b0   : > { %v767_v45 = vpop.xlane.xlu2 %766 }
 0x1b1   : > { %v859_v26 = vperm.slane %v767_v45, %v1926_v49  ;;  %v785_v21 = vpop.xlane.xlu1 %784 }
 0x1b2   : > { %v872_v57 = vperm.slane %v785_v21, %v1929_v50 }
 0x1b3   : > { %v861_v56 = vsel %vm827_vm0, %v860_v41, %v859_v26 }
 0x1b4   : > { %v890_v61 = vsel %vm878_vm4, %v861_v56, %v889_v55  ;;  %v873_v6 = vsel %vm827_vm0, %v872_v57, %v871_v63 }
 0x1b5   : > { %v891_v0 = vsel %vm880_vm5, %v864_v42, %v890_v61 }
 0x1b6   : > { %v892_v3 = vsel %vm882_vm6, %v867_v51, %v891_v0 }
 0x1b7   : > { %v893_v7 = vsel %vm884_vm7, %v870_v1, %v892_v3 }
 0x1b8   : > { %v894_v10 = vsel %vm886_vm8, %v873_v6, %v893_v7  ;;  %v753_v11 = vpop.xlane.xlu2 %752 }
 0x1b9   : > { %v898_v14 = vsel %vm791_vm9, %v894_v10, -1e+30  ;;  %v848_v9 = vperm.slane %v753_v11, %v1929_v50 }
 0x1ba   : > { %904 = vst.msk [vmem:[#allocation2 + $0x8] sm:$0xff] %vm902_vm10, %v898_v14 }
 0x1bb   : > { %v849_v16 = vsel %vm827_vm0, %v848_v9, %v847_v12 }
 0x1bc   : > { %v887_v18 = vsel %vm886_vm8, %v849_v16, %v885_v15 }
 0x1bd   : > { %v897_v19 = vsel %vm791_vm9, %v887_v18, -1e+30 }
 0x1be   : > { %903 = vst.msk [vmem:[#allocation2] sm:$0xff] %vm902_vm10, %v897_v19 }
 0x1c1   : > { %v906_v48 = vld [vmem:[#allocation2 + $0x8] sm:$0xff] }
 0x1c2   : > { %909 = vmax.xlane.f32.xlu0 %v906_v48 }
 0x1c5   : > { %v905_v20 = vld [vmem:[#allocation2] sm:$0xff] }
 0x1c6   : > { %907 = vmax.xlane.f32.xlu2 %v905_v20 }
 0x235   : > { %v910_v22 = vpop.xlane.xlu0 %909 }
 0x236   : > { %v912_v23 = vsub.f32 %v906_v48, %v910_v22 }
 0x238   : > { %v915_v50 = vmul.f32 1.442695, %v912_v23 }
 0x239   : > { %v908_v25 = vpop.xlane.xlu2 %907 }
 0x23a   : > { %1330 = vpow2.f32 %v915_v50  ;;  %v911_v27 = vsub.f32 %v905_v20, %v908_v25 }
 0x23c   : > { %v913_v28 = vmul.f32 1.442695, %v911_v27 }
 0x23e   : > { %1332 = vpow2.f32 %v913_v28 }
 0x240   : > { %v1331_v29 = vpop.eup %1330 }
 0x241   : > { %919 = vadd.xlane.f32.xlu2 %v1331_v29 }
 0x244   : > { %v1333_v30 = vpop.eup %1332 }
 0x245   : > { %917 = vadd.xlane.f32.xlu1 %v1333_v30 }
 0x2b4   : > { %v920_v49 = vpop.xlane.xlu2 %919 }
 0x2b5   : > { %1334 = vrcp.f32 %v920_v49  ;;  %v945_v35 = vand.u32 2147483647, %v920_v49  ;;  %v947_v36 = vand.u32 2147483648, %v920_v49  ;;  %vm941_vm12 = vweird.f32 %v920_v49 }
 0x2b7   : > { %vm946_vm14 = vcmp.eq.f32.partialorder %v945_v35, 8.507059e+37  ;;  %v948_v24 = vor.u32 1.1754944e-38, %v947_v36 }
 0x2b8   : > { %v918_v31 = vpop.xlane.xlu1 %917 }
 0x2b9   : > { %1336 = vrcp.f32 %v918_v31  ;;  %v932_v41 = vand.u32 2147483648, %v918_v31  ;;  %v930_v44 = vand.u32 2147483647, %v918_v31  ;;  %vm926_vm0 = vweird.f32 %v918_v31 }
 0x2bb   : > { %v1335_v17 = vpop.eup %1334  ;;  %v933_v26 = vor.u32 1.1754944e-38, %v932_v41  ;;  %vm931_vm2 = vcmp.eq.f32.partialorder %v930_v44, 8.507059e+37 }
 0x2bc   : > { %v937_v32 = vmul.f32 %v1335_v17, %v920_v49  ;;  %vm942_vm11 = vweird.f32 %v1335_v17 }
 0x2bd   : > { %vm943_vm13 = vmor %vm941_vm12, %vm942_vm11 }
 0x2be   : > { %v938_v33 = vsub.f32 1.0, %v937_v32 }
 0x2bf   : > { %v1337_v34 = vpop.eup %1336 }
 0x2c0   : > { %v939_v37 = vmul.f32 %v1335_v17, %v938_v33  ;;  %v922_v38 = vmul.f32 %v1337_v34, %v918_v31  ;;  %vm927_vm15 = vweird.f32 %v1337_v34 }
 0x2c1   : > { %vm928_vm1 = vmor %vm926_vm0, %vm927_vm15 }
 0x2c2   : > { %v940_v39 = vadd.f32 %v1335_v17, %v939_v37  ;;  %v923_v40 = vsub.f32 1.0, %v922_v38 }
 0x2c4   : > { %v944_v42 = vsel %vm943_vm13, %v1335_v17, %v940_v39  ;;  %v924_v43 = vmul.f32 %v1337_v34, %v923_v40 }
 0x2c5   : > { %v949_v45 = vsel %vm946_vm14, %v948_v24, %v944_v42 }
 0x2c6   : > { %v950_v46 = vmul.f32 %v1331_v29, %v949_v45  ;;  %v925_v47 = vadd.f32 %v1337_v34, %v924_v43 }
 0x2c8   : > { %952 = vst [vmem:[%s363_s24 + $0x8] sm:$0xff] %v950_v46  ;;  %v929_v51 = vsel %vm928_vm1, %v1337_v34, %v925_v47 }
 0x2c9   : > { %v934_v52 = vsel %vm931_vm2, %v933_v26, %v929_v51 }
 0x2ca   : > { %v935_v53 = vmul.f32 %v1333_v30, %v934_v52 }
 0x2cc   : > { %951 = vst [vmem:[%s363_s24] sm:$0xff] %v935_v53 }
 0x2cd   : > { %1485 = shalt.err (!%p1482_p0)
}
 0x2ce   : > { %s1559_s2 = smov 128   ;;  %s1560_s23 = smov 8  }
 0x2cf   : > { %1183 = dma.vmem_to_hbm [thread:$0]  (%p1681_p7), %s967_s15, 256, %s969_s13, %s954_s12, %s1559_s2, %s1559_s2, %s1560_s23  }
 0x2d0 PF: > { %s2082_s10 = sld [smem:[#allocation17_spill]]  ;;  %p1200_p3 = pnand %p1100_p11, %p1641_p6 }
 0x2d2   : > { %p1201_p5 = pneg %p1200_p3 }
 0x2d6   : > { %s983_s29 = sand.u32 1, %s2082_s10  }
 0x2d7   : > { %s984_s11 = scalar_lea.sflag [#allocation5], %s983_s29 }
 0x2d8   : > { %1527 = dma.done.wait (%p1201_p5), %s984_s11, 256  }
 0x2d9   : > { %1529 = vsyncadd (%p1201_p5), %s984_s11, 4294967040  ;;  %s26_s26 = sadd.s32 1, %s1552_s26   ;;  %s2084_s14 = sld [smem:[#allocation18_spill]] }
 0x2da   : > { %p23_p9 = scmp.ge.s32.totalorder %s26_s26, 4   ;;  %s2085_s23 = sld [smem:[#allocation21_spill]] }
 0x2db   : > { %s2086_s8 = sld [smem:[#allocation20_spill]]  ;;  %s2087_s21 = smov %s1536_s22 }
 0x2dc   : > { %s2089_s24 = smov %s1548_s25 }
 0x2dd   :  { %25 = sbr.rel (!%p23_p9) target bundleno = 12 (0xc), region = 110 }
 0x2df   : > { %s2088_s22 = smov %s2084_s14 }
 0x2e1   : > { %s2090_s25 = smov %s2086_s8 }
 0x2e2   :  { %990 = vsyncpa [#allocation4], 1 }
 0x2e3   :  { %992 = vsyncpa [#allocation4 + $0x1], 1 }
 0x2e4   :  { %993 = vsyncpa [#allocation7], 1 }
 0x2e5   :  { %995 = vsyncpa [#allocation7 + $0x1], 1 }
 0x2e6   :  { %996 = vsyncpa [#allocation10], 1 }
 0x2e7   :  { %997 = vsyncpa [#allocation5], 1 }
 0x2e8   :  { %999 = vsyncpa [#allocation5 + $0x1], 1 }

</bundles_post_ra>
